<compile_context>
chip_gen: v7x
topology: tpu7x:2x2x1
jax: 0.10.0
libtpu: 0.0.40
codegen_flags: <defaults>
</compile_context>

<pallas_src>
import numpy as np

import jax
import jax.numpy as jnp
from jax.experimental import pallas as pl
from jax.experimental.pallas import tpu as pltpu


# ---------------------------------------------------------------------------
# Pallas kernels
# ---------------------------------------------------------------------------
def _conv_pool_relu_kernel(r0_ref, r1_ref, a_ref, b_ref, o_ref):
    """Fused 3x3 'same' conv + bias + 2x2 max-pool + ReLU for one image.

    r0_ref/r1_ref : (1, Ho+1, (W+2)*Cin)  even / odd padded input rows (f32)
    a_ref         : (6, (W+2)*Cin, Wo*Cout) bf16 block-banded weights,
                    index = qw*3 + dh (W-quadrant, row tap)
    b_ref         : (1, Wo*Cout) f32 bias, tiled per output column
    o_ref         : (1, Ho, Wo*Cout)
    """
    ho = o_ref.shape[1]
    rows = (r0_ref[0], r1_ref[0])                     # each (Ho+1, (W+2)*Cin)
    pooled = None
    for qh in range(2):                               # pool quadrant (rows)
        for qw in range(2):                           # pool quadrant (cols)
            acc = None
            for dh in range(3):                       # 3 row taps
                u = qh + dh                           # padded full-res row offset
                xs = rows[u % 2][u // 2: u // 2 + ho, :].astype(jnp.bfloat16)
                part = jnp.dot(xs, a_ref[qw * 3 + dh],
                               preferred_element_type=jnp.float32)
                acc = part if acc is None else acc + part
            pooled = acc if pooled is None else jnp.maximum(pooled, acc)
    out = jnp.maximum(pooled + b_ref[...], 0.0)       # bias + ReLU (f32)
    o_ref[0] = out.astype(o_ref.dtype)


def _fc_fused_kernel(x_ref, w1_ref, b1_ref, w2_ref, b2_ref, o_ref):
    """o = (relu(x @ w1 + b1)) @ w2 + b2, all in one VMEM-resident body."""
    h = jnp.dot(x_ref[...].astype(jnp.bfloat16), w1_ref[...],
                preferred_element_type=jnp.float32)
    h = jnp.maximum(h + b1_ref[...], 0.0)
    # TODO(synk): dropout(p=0.3) is identity in eval mode; training-mode mask
    #             (pltpu.prng_random_bits + 1/(1-p) scale) not implemented.
    out = jnp.dot(h.astype(jnp.bfloat16), w2_ref[...],
                  preferred_element_type=jnp.float32)
    o_ref[...] = (out + b2_ref[...]).astype(o_ref.dtype)


# ---------------------------------------------------------------------------
# Pallas wrappers
# ---------------------------------------------------------------------------
def conv3x3_pool2_relu(x_packed, a_mat, bias_tiled, cin):
    """x_packed: (B, H, W*cin) f32 -> (B, H/2, (W/2)*cout) f32."""
    B, H, _ = x_packed.shape
    ho = H // 2
    hh = ho + 1                                   # rows per polyphase plane
    k = a_mat.shape[1]                            # (W+2)*cin
    wocout = a_mat.shape[2]                       # (W/2)*cout  (lane-dense)

    # 'same' padding (1 row top/bottom, cin lanes left/right), then split the
    # padded rows by parity so all in-kernel row accesses are contiguous.
    xp = jnp.pad(x_packed, ((0, 0), (1, 1), (cin, cin)))
    r0 = xp[:, 0::2, :]                           # (B, ho+1, k)
    r1 = xp[:, 1::2, :]                           # (B, ho+1, k)

    return pl.pallas_call(
        _conv_pool_relu_kernel,
        out_shape=jax.ShapeDtypeStruct((B, ho, wocout), jnp.float32),
        grid=(B,),
        in_specs=[
            pl.BlockSpec((1, hh, k), lambda i: (i, 0, 0)),
            pl.BlockSpec((1, hh, k), lambda i: (i, 0, 0)),
            pl.BlockSpec((6, k, wocout), lambda i: (0, 0, 0)),   # resident
            pl.BlockSpec((1, wocout), lambda i: (0, 0)),         # resident
        ],
        out_specs=pl.BlockSpec((1, ho, wocout), lambda i: (i, 0, 0)),
        compiler_params=pltpu.CompilerParams(
            dimension_semantics=("parallel",)),
    )(r0, r1, a_mat, bias_tiled)


def _pick_m_tile(B):
    for cand in (512, 256, 128, 64, 32, 16, 8):
        if B % cand == 0:
            return cand
    return B


def fc_fused(x, w1, b1, w2, b2):
    """x: (B, 1568) f32 -> (B, 128) f32 (fc1+relu+fc2, padded to 128 lanes)."""
    B, K = x.shape
    N1 = w1.shape[1]
    N2 = w2.shape[1]
    bm = _pick_m_tile(B)
    return pl.pallas_call(
        _fc_fused_kernel,
        out_shape=jax.ShapeDtypeStruct((B, N2), jnp.float32),
        grid=(pl.cdiv(B, bm),),
        in_specs=[
            pl.BlockSpec((bm, K), lambda i: (i, 0)),
            pl.BlockSpec((K, N1), lambda i: (0, 0)),
            pl.BlockSpec((1, N1), lambda i: (0, 0)),
            pl.BlockSpec((N1, N2), lambda i: (0, 0)),
            pl.BlockSpec((1, N2), lambda i: (0, 0)),
        ],
        out_specs=pl.BlockSpec((bm, N2), lambda i: (i, 0)),
        compiler_params=pltpu.CompilerParams(
            dimension_semantics=("parallel",)),
    )(x, w1, b1, w2, b2)


# ---------------------------------------------------------------------------
# One-time weight preparation (torch layout -> kernel layout), done at init.
# ---------------------------------------------------------------------------
def _banded_conv_pool_matrix(cw, W):
    """cw: torch conv weight (Cout, Cin, 3, 3) -> (6, (W+2)*Cin, (W/2)*Cout).

    Entry [(qw*3+dh), (2j+qw+dw)*Cin+ci, j*Cout+co] = cw[co, ci, dh, dw]:
    multiplying a packed padded input row by this matrix yields the conv
    output of the (qw) pool-quadrant columns for that row tap.
    """
    cout, cin, _, _ = cw.shape
    wo, wp = W // 2, W + 2
    k = cw.transpose(2, 3, 1, 0)                       # (dh, dw, ci, co)
    a = np.zeros((2, 3, wp, cin, wo, cout), np.float32)
    for qw in range(2):
        for dh in range(3):
            for dw in range(3):
                for j in range(wo):
                    a[qw, dh, 2 * j + qw + dw, :, j, :] = k[dh, dw]
    return a.reshape(2 * 3, wp * cin, wo * cout)


def prepare_params(params):
    """Convert torch-layout params into kernel-ready (bf16 weight) layout."""
    c1w, c1b, c2w, c2b, f1w, f1b, f2w, f2b = [
        np.asarray(p, np.float32) for p in params]

    a1 = _banded_conv_pool_matrix(c1w, W=28)           # (6, 30, 140)
    bt1 = np.tile(c1b, 14)[None, :]                    # (1, 140)
    a2 = _banded_conv_pool_matrix(c2w, W=14)           # (6, 160, 224)
    bt2 = np.tile(c2b, 7)[None, :]                     # (1, 224)

    # fc1: permute columns from torch (c, h, w) flatten order to packed
    # (h, w, c) order; pad N from 100 -> 128 lanes.
    w1 = f1w.reshape(100, 32, 7, 7).transpose(2, 3, 1, 0).reshape(7 * 7 * 32, 100)
    w1p = np.zeros((1568, 128), np.float32); w1p[:, :100] = w1
    b1p = np.zeros((1, 128), np.float32);    b1p[0, :100] = f1b
    # fc2: pad K 100 -> 128 (zero rows) and N 10 -> 128 (zero cols).
    w2p = np.zeros((128, 128), np.float32);  w2p[:100, :10] = f2w.T
    b2p = np.zeros((1, 128), np.float32);    b2p[0, :10] = f2b

    return (jnp.asarray(a1, jnp.bfloat16), jnp.asarray(bt1, jnp.float32),
            jnp.asarray(a2, jnp.bfloat16), jnp.asarray(bt2, jnp.float32),
            jnp.asarray(w1p, jnp.bfloat16), jnp.asarray(b1p, jnp.float32),
            jnp.asarray(w2p, jnp.bfloat16), jnp.asarray(b2p, jnp.float32))


# ---------------------------------------------------------------------------
# Forward pass equivalent to myModel.forward (inference / eval mode)
# ---------------------------------------------------------------------------
def my_model_forward(x, prep):
    """x: (B, 1, 28, 28) f32 NCHW -> logits (B, 10) f32."""
    a1, bt1, a2, bt2, w1p, b1p, w2p, b2p = prep
    B = x.shape[0]

    x0 = x.reshape(B, 28, 28)                          # Cin=1 packed layout
    y1 = conv3x3_pool2_relu(x0, a1, bt1, cin=1)        # (B, 14, 140)
    y2 = conv3x3_pool2_relu(y1, a2, bt2, cin=10)       # (B, 7, 224)
    flat = y2.reshape(B, 7 * 224)                      # (B, 1568), (h,w,c) order
    logits = fc_fused(flat, w1p, b1p, w2p, b2p)        # (B, 128)
    return logits[:, :10]


def init_params(key):
    """Torch-layout parameters of myModel."""
    ks = jax.random.split(key, 8)
    c1w = 0.1 * jax.random.normal(ks[0], (10, 1, 3, 3), jnp.float32)
    c1b = 0.1 * jax.random.normal(ks[1], (10,), jnp.float32)
    c2w = 0.05 * jax.random.normal(ks[2], (32, 10, 3, 3), jnp.float32)
    c2b = 0.05 * jax.random.normal(ks[3], (32,), jnp.float32)
    f1w = 0.02 * jax.random.normal(ks[4], (100, 32 * 7 * 7), jnp.float32)
    f1b = 0.02 * jax.random.normal(ks[5], (100,), jnp.float32)
    f2w = 0.05 * jax.random.normal(ks[6], (10, 100), jnp.float32)
    f2b = 0.05 * jax.random.normal(ks[7], (10,), jnp.float32)
    return (c1w, c1b, c2w, c2b, f1w, f1b, f2w, f2b)


def _reference_forward(x, params):
    """Pure-JAX reference (f32) mirroring the PyTorch module, for sanity."""
    c1w, c1b, c2w, c2b, f1w, f1b, f2w, f2b = params

    def conv(z, w, b):
        y = jax.lax.conv_general_dilated(
            z, w, (1, 1), 'SAME', dimension_numbers=('NCHW', 'OIHW', 'NCHW'))
        return y + b[None, :, None, None]

    def pool(y):
        B, C, H, W = y.shape
        return y.reshape(B, C, H // 2, 2, W // 2, 2).max(axis=(3, 5))

    y = jax.nn.relu(pool(conv(x, c1w, c1b)))
    y = jax.nn.relu(pool(conv(y, c2w, c2b)))
    y = y.reshape(y.shape[0], -1)
    h = jax.nn.relu(y @ f1w.T + f1b)
    return h @ f2w.T + f2b


if __name__ == "__main__":
    key = jax.random.PRNGKey(0)
    k_x, k_p = jax.random.split(key)
    # Input must be 28x28 so fc1's 32*7*7 input dimension matches.
    x = jax.random.normal(k_x, (2, 1, 28, 28), jnp.float32)  # NCHW
    params = init_params(k_p)
    prep = prepare_params(params)                     # one-time weight repack

    logits = jax.jit(my_model_forward)(x, prep)
    jax.block_until_ready(logits)
    assert logits.shape == (2, 10) and logits.dtype == jnp.float32

    ref = _reference_forward(x, params)
    max_err = float(jnp.max(jnp.abs(logits - ref)))
    assert max_err < 2e-2, f"numerical mismatch vs reference: {max_err}"

    print("KERNEL_OK")
</pallas_src>

<mosaic_0001>
module attributes {stable_mosaic.version = 11 : i64} {
  func.func @_conv_pool_relu_kernel(%arg0: i32, %arg1: memref<1x15x30xf32, #tpu.memory_space<vmem>>, %arg2: memref<1x15x30xf32, #tpu.memory_space<vmem>>, %arg3: memref<6x30x140xbf16, #tpu.memory_space<vmem>>, %arg4: memref<1x140xf32, #tpu.memory_space<vmem>>, %arg5: memref<1x14x140xf32, #tpu.memory_space<vmem>>) attributes {dimension_semantics = [#tpu.dimension_semantics<parallel>], iteration_bounds = array<i64: 2>, scalar_prefetch = 0 : i64, scratch_operands = 0 : i64, tpu.core_type = #tpu.core_type<tc>, window_params = [{transform_indices = @transform_0, window_bounds = array<i64: 1, 15, 30>}, {transform_indices = @transform_1, window_bounds = array<i64: 1, 15, 30>}, {pipeline_mode = #tpu.pipeline_mode<synchronous>, transform_indices = @transform_2, window_bounds = array<i64: 6, 30, 140>}, {pipeline_mode = #tpu.pipeline_mode<synchronous>, transform_indices = @transform_3, window_bounds = array<i64: 1, 140>}, {transform_indices = @transform_4, window_bounds = array<i64: 1, 14, 140>}]} {
    %c0 = arith.constant 0 : index
    %c0_0 = arith.constant 0 : index
    %c0_1 = arith.constant 0 : index
    %0 = vector.load %arg1[%c0, %c0_0, %c0_1] : memref<1x15x30xf32, #tpu.memory_space<vmem>>, vector<1x15x30xf32>
    %1 = vector.shape_cast %0 : vector<1x15x30xf32> to vector<15x30xf32>
    %c0_2 = arith.constant 0 : index
    %c0_3 = arith.constant 0 : index
    %c0_4 = arith.constant 0 : index
    %2 = vector.load %arg2[%c0_2, %c0_3, %c0_4] : memref<1x15x30xf32, #tpu.memory_space<vmem>>, vector<1x15x30xf32>
    %3 = vector.shape_cast %2 : vector<1x15x30xf32> to vector<15x30xf32>
    %4 = vector.extract_strided_slice %1 {offsets = [0, 0], sizes = [14, 30], strides = [1, 1]} : vector<15x30xf32> to vector<14x30xf32>
    %5 = arith.truncf %4 : vector<14x30xf32> to vector<14x30xbf16>
    %c0_5 = arith.constant 0 : index
    %c0_6 = arith.constant 0 : index
    %c0_7 = arith.constant 0 : index
    %6 = vector.load %arg3[%c0_5, %c0_6, %c0_7] : memref<6x30x140xbf16, #tpu.memory_space<vmem>>, vector<1x30x140xbf16>
    %7 = vector.shape_cast %6 : vector<1x30x140xbf16> to vector<30x140xbf16>
    %cst = arith.constant dense<0.000000e+00> : vector<14x140xf32>
    %8 = tpu.matmul %5, %7, %cst {dimension_numbers = #tpu.dot_dimension_numbers<[1], [0], [0], [1], [0, 0, 1, 1], [], []>} : vector<14x30xbf16>, vector<30x140xbf16>, vector<14x140xf32> -> vector<14x140xf32>
    %9 = vector.extract_strided_slice %3 {offsets = [0, 0], sizes = [14, 30], strides = [1, 1]} : vector<15x30xf32> to vector<14x30xf32>
    %10 = arith.truncf %9 : vector<14x30xf32> to vector<14x30xbf16>
    %c1 = arith.constant 1 : index
    %c0_8 = arith.constant 0 : index
    %c0_9 = arith.constant 0 : index
    %11 = vector.load %arg3[%c1, %c0_8, %c0_9] : memref<6x30x140xbf16, #tpu.memory_space<vmem>>, vector<1x30x140xbf16>
    %12 = vector.shape_cast %11 : vector<1x30x140xbf16> to vector<30x140xbf16>
    %cst_10 = arith.constant dense<0.000000e+00> : vector<14x140xf32>
    %13 = tpu.matmul %10, %12, %cst_10 {dimension_numbers = #tpu.dot_dimension_numbers<[1], [0], [0], [1], [0, 0, 1, 1], [], []>} : vector<14x30xbf16>, vector<30x140xbf16>, vector<14x140xf32> -> vector<14x140xf32>
    %14 = arith.addf %8, %13 : vector<14x140xf32>
    %15 = vector.extract_strided_slice %1 {offsets = [1, 0], sizes = [14, 30], strides = [1, 1]} : vector<15x30xf32> to vector<14x30xf32>
    %16 = arith.truncf %15 : vector<14x30xf32> to vector<14x30xbf16>
    %c2 = arith.constant 2 : index
    %c0_11 = arith.constant 0 : index
    %c0_12 = arith.constant 0 : index
    %17 = vector.load %arg3[%c2, %c0_11, %c0_12] : memref<6x30x140xbf16, #tpu.memory_space<vmem>>, vector<1x30x140xbf16>
    %18 = vector.shape_cast %17 : vector<1x30x140xbf16> to vector<30x140xbf16>
    %cst_13 = arith.constant dense<0.000000e+00> : vector<14x140xf32>
    %19 = tpu.matmul %16, %18, %cst_13 {dimension_numbers = #tpu.dot_dimension_numbers<[1], [0], [0], [1], [0, 0, 1, 1], [], []>} : vector<14x30xbf16>, vector<30x140xbf16>, vector<14x140xf32> -> vector<14x140xf32>
    %20 = arith.addf %14, %19 : vector<14x140xf32>
    %21 = vector.extract_strided_slice %1 {offsets = [0, 0], sizes = [14, 30], strides = [1, 1]} : vector<15x30xf32> to vector<14x30xf32>
    %22 = arith.truncf %21 : vector<14x30xf32> to vector<14x30xbf16>
    %c3 = arith.constant 3 : index
    %c0_14 = arith.constant 0 : index
    %c0_15 = arith.constant 0 : index
    %23 = vector.load %arg3[%c3, %c0_14, %c0_15] : memref<6x30x140xbf16, #tpu.memory_space<vmem>>, vector<1x30x140xbf16>
    %24 = vector.shape_cast %23 : vector<1x30x140xbf16> to vector<30x140xbf16>
    %cst_16 = arith.constant dense<0.000000e+00> : vector<14x140xf32>
    %25 = tpu.matmul %22, %24, %cst_16 {dimension_numbers = #tpu.dot_dimension_numbers<[1], [0], [0], [1], [0, 0, 1, 1], [], []>} : vector<14x30xbf16>, vector<30x140xbf16>, vector<14x140xf32> -> vector<14x140xf32>
    %26 = vector.extract_strided_slice %3 {offsets = [0, 0], sizes = [14, 30], strides = [1, 1]} : vector<15x30xf32> to vector<14x30xf32>
    %27 = arith.truncf %26 : vector<14x30xf32> to vector<14x30xbf16>
    %c4 = arith.constant 4 : index
    %c0_17 = arith.constant 0 : index
    %c0_18 = arith.constant 0 : index
    %28 = vector.load %arg3[%c4, %c0_17, %c0_18] : memref<6x30x140xbf16, #tpu.memory_space<vmem>>, vector<1x30x140xbf16>
    %29 = vector.shape_cast %28 : vector<1x30x140xbf16> to vector<30x140xbf16>
    %cst_19 = arith.constant dense<0.000000e+00> : vector<14x140xf32>
    %30 = tpu.matmul %27, %29, %cst_19 {dimension_numbers = #tpu.dot_dimension_numbers<[1], [0], [0], [1], [0, 0, 1, 1], [], []>} : vector<14x30xbf16>, vector<30x140xbf16>, vector<14x140xf32> -> vector<14x140xf32>
    %31 = arith.addf %25, %30 : vector<14x140xf32>
    %32 = vector.extract_strided_slice %1 {offsets = [1, 0], sizes = [14, 30], strides = [1, 1]} : vector<15x30xf32> to vector<14x30xf32>
    %33 = arith.truncf %32 : vector<14x30xf32> to vector<14x30xbf16>
    %c5 = arith.constant 5 : index
    %c0_20 = arith.constant 0 : index
    %c0_21 = arith.constant 0 : index
    %34 = vector.load %arg3[%c5, %c0_20, %c0_21] : memref<6x30x140xbf16, #tpu.memory_space<vmem>>, vector<1x30x140xbf16>
    %35 = vector.shape_cast %34 : vector<1x30x140xbf16> to vector<30x140xbf16>
    %cst_22 = arith.constant dense<0.000000e+00> : vector<14x140xf32>
    %36 = tpu.matmul %33, %35, %cst_22 {dimension_numbers = #tpu.dot_dimension_numbers<[1], [0], [0], [1], [0, 0, 1, 1], [], []>} : vector<14x30xbf16>, vector<30x140xbf16>, vector<14x140xf32> -> vector<14x140xf32>
    %37 = arith.addf %31, %36 : vector<14x140xf32>
    %38 = arith.maximumf %20, %37 : vector<14x140xf32>
    %39 = vector.extract_strided_slice %3 {offsets = [0, 0], sizes = [14, 30], strides = [1, 1]} : vector<15x30xf32> to vector<14x30xf32>
    %40 = arith.truncf %39 : vector<14x30xf32> to vector<14x30xbf16>
    %c0_23 = arith.constant 0 : index
    %c0_24 = arith.constant 0 : index
    %c0_25 = arith.constant 0 : index
    %41 = vector.load %arg3[%c0_23, %c0_24, %c0_25] : memref<6x30x140xbf16, #tpu.memory_space<vmem>>, vector<1x30x140xbf16>
    %42 = vector.shape_cast %41 : vector<1x30x140xbf16> to vector<30x140xbf16>
    %cst_26 = arith.constant dense<0.000000e+00> : vector<14x140xf32>
    %43 = tpu.matmul %40, %42, %cst_26 {dimension_numbers = #tpu.dot_dimension_numbers<[1], [0], [0], [1], [0, 0, 1, 1], [], []>} : vector<14x30xbf16>, vector<30x140xbf16>, vector<14x140xf32> -> vector<14x140xf32>
    %44 = vector.extract_strided_slice %1 {offsets = [1, 0], sizes = [14, 30], strides = [1, 1]} : vector<15x30xf32> to vector<14x30xf32>
    %45 = arith.truncf %44 : vector<14x30xf32> to vector<14x30xbf16>
    %c1_27 = arith.constant 1 : index
    %c0_28 = arith.constant 0 : index
    %c0_29 = arith.constant 0 : index
    %46 = vector.load %arg3[%c1_27, %c0_28, %c0_29] : memref<6x30x140xbf16, #tpu.memory_space<vmem>>, vector<1x30x140xbf16>
    %47 = vector.shape_cast %46 : vector<1x30x140xbf16> to vector<30x140xbf16>
    %cst_30 = arith.constant dense<0.000000e+00> : vector<14x140xf32>
    %48 = tpu.matmul %45, %47, %cst_30 {dimension_numbers = #tpu.dot_dimension_numbers<[1], [0], [0], [1], [0, 0, 1, 1], [], []>} : vector<14x30xbf16>, vector<30x140xbf16>, vector<14x140xf32> -> vector<14x140xf32>
    %49 = arith.addf %43, %48 : vector<14x140xf32>
    %50 = vector.extract_strided_slice %3 {offsets = [1, 0], sizes = [14, 30], strides = [1, 1]} : vector<15x30xf32> to vector<14x30xf32>
    %51 = arith.truncf %50 : vector<14x30xf32> to vector<14x30xbf16>
    %c2_31 = arith.constant 2 : index
    %c0_32 = arith.constant 0 : index
    %c0_33 = arith.constant 0 : index
    %52 = vector.load %arg3[%c2_31, %c0_32, %c0_33] : memref<6x30x140xbf16, #tpu.memory_space<vmem>>, vector<1x30x140xbf16>
    %53 = vector.shape_cast %52 : vector<1x30x140xbf16> to vector<30x140xbf16>
    %cst_34 = arith.constant dense<0.000000e+00> : vector<14x140xf32>
    %54 = tpu.matmul %51, %53, %cst_34 {dimension_numbers = #tpu.dot_dimension_numbers<[1], [0], [0], [1], [0, 0, 1, 1], [], []>} : vector<14x30xbf16>, vector<30x140xbf16>, vector<14x140xf32> -> vector<14x140xf32>
    %55 = arith.addf %49, %54 : vector<14x140xf32>
    %56 = arith.maximumf %38, %55 : vector<14x140xf32>
    %57 = vector.extract_strided_slice %3 {offsets = [0, 0], sizes = [14, 30], strides = [1, 1]} : vector<15x30xf32> to vector<14x30xf32>
    %58 = arith.truncf %57 : vector<14x30xf32> to vector<14x30xbf16>
    %c3_35 = arith.constant 3 : index
    %c0_36 = arith.constant 0 : index
    %c0_37 = arith.constant 0 : index
    %59 = vector.load %arg3[%c3_35, %c0_36, %c0_37] : memref<6x30x140xbf16, #tpu.memory_space<vmem>>, vector<1x30x140xbf16>
    %60 = vector.shape_cast %59 : vector<1x30x140xbf16> to vector<30x140xbf16>
    %cst_38 = arith.constant dense<0.000000e+00> : vector<14x140xf32>
    %61 = tpu.matmul %58, %60, %cst_38 {dimension_numbers = #tpu.dot_dimension_numbers<[1], [0], [0], [1], [0, 0, 1, 1], [], []>} : vector<14x30xbf16>, vector<30x140xbf16>, vector<14x140xf32> -> vector<14x140xf32>
    %62 = vector.extract_strided_slice %1 {offsets = [1, 0], sizes = [14, 30], strides = [1, 1]} : vector<15x30xf32> to vector<14x30xf32>
    %63 = arith.truncf %62 : vector<14x30xf32> to vector<14x30xbf16>
    %c4_39 = arith.constant 4 : index
    %c0_40 = arith.constant 0 : index
    %c0_41 = arith.constant 0 : index
    %64 = vector.load %arg3[%c4_39, %c0_40, %c0_41] : memref<6x30x140xbf16, #tpu.memory_space<vmem>>, vector<1x30x140xbf16>
    %65 = vector.shape_cast %64 : vector<1x30x140xbf16> to vector<30x140xbf16>
    %cst_42 = arith.constant dense<0.000000e+00> : vector<14x140xf32>
    %66 = tpu.matmul %63, %65, %cst_42 {dimension_numbers = #tpu.dot_dimension_numbers<[1], [0], [0], [1], [0, 0, 1, 1], [], []>} : vector<14x30xbf16>, vector<30x140xbf16>, vector<14x140xf32> -> vector<14x140xf32>
    %67 = arith.addf %61, %66 : vector<14x140xf32>
    %68 = vector.extract_strided_slice %3 {offsets = [1, 0], sizes = [14, 30], strides = [1, 1]} : vector<15x30xf32> to vector<14x30xf32>
    %69 = arith.truncf %68 : vector<14x30xf32> to vector<14x30xbf16>
    %c5_43 = arith.constant 5 : index
    %c0_44 = arith.constant 0 : index
    %c0_45 = arith.constant 0 : index
    %70 = vector.load %arg3[%c5_43, %c0_44, %c0_45] : memref<6x30x140xbf16, #tpu.memory_space<vmem>>, vector<1x30x140xbf16>
    %71 = vector.shape_cast %70 : vector<1x30x140xbf16> to vector<30x140xbf16>
    %cst_46 = arith.constant dense<0.000000e+00> : vector<14x140xf32>
    %72 = tpu.matmul %69, %71, %cst_46 {dimension_numbers = #tpu.dot_dimension_numbers<[1], [0], [0], [1], [0, 0, 1, 1], [], []>} : vector<14x30xbf16>, vector<30x140xbf16>, vector<14x140xf32> -> vector<14x140xf32>
    %73 = arith.addf %67, %72 : vector<14x140xf32>
    %74 = arith.maximumf %56, %73 : vector<14x140xf32>
    %c0_47 = arith.constant 0 : index
    %c0_48 = arith.constant 0 : index
    %75 = vector.load %arg4[%c0_47, %c0_48] : memref<1x140xf32, #tpu.memory_space<vmem>>, vector<1x140xf32>
    %76 = vector.broadcast %75 : vector<1x140xf32> to vector<14x140xf32>
    %77 = arith.addf %74, %76 : vector<14x140xf32>
    %cst_49 = arith.constant 0.000000e+00 : f32
    %78 = vector.broadcast %cst_49 : f32 to vector<14x140xf32>
    %79 = arith.maximumf %77, %78 : vector<14x140xf32>
    %c0_50 = arith.constant 0 : index
    %c0_51 = arith.constant 0 : index
    %c0_52 = arith.constant 0 : index
    %80 = vector.load %arg5[%c0_50, %c0_51, %c0_52] : memref<1x14x140xf32, #tpu.memory_space<vmem>>, vector<1x14x140xf32>
    %81 = vector.shape_cast %80 : vector<1x14x140xf32> to vector<14x140xf32>
    %82 = vector.shape_cast %79 : vector<14x140xf32> to vector<1x14x140xf32>
    tpu.vector_store %arg5[%c0_50, %c0_51, %c0_52], %82 {strides = array<i32>} : memref<1x14x140xf32, #tpu.memory_space<vmem>>, vector<1x14x140xf32>,
    return
  }
  func.func @transform_0(%arg0: i32) -> (i32, i32, i32) {
    %c0_i32 = arith.constant 0 : i32
    %c0_i32_0 = arith.constant 0 : i32
    %c0_i32_1 = arith.constant 0 : i32
    return %arg0, %c0_i32, %c0_i32_0 : i32, i32, i32
  }
  func.func @transform_1(%arg0: i32) -> (i32, i32, i32) {
    %c0_i32 = arith.constant 0 : i32
    %c0_i32_0 = arith.constant 0 : i32
    %c0_i32_1 = arith.constant 0 : i32
    return %arg0, %c0_i32, %c0_i32_0 : i32, i32, i32
  }
  func.func @transform_2(%arg0: i32) -> (i32, i32, i32) {
    %c0_i32 = arith.constant 0 : i32
    %c0_i32_0 = arith.constant 0 : i32
    %c0_i32_1 = arith.constant 0 : i32
    %c0_i32_2 = arith.constant 0 : i32
    return %c0_i32, %c0_i32_0, %c0_i32_1 : i32, i32, i32
  }
  func.func @transform_3(%arg0: i32) -> (i32, i32) {
    %c0_i32 = arith.constant 0 : i32
    %c0_i32_0 = arith.constant 0 : i32
    %c0_i32_1 = arith.constant 0 : i32
    return %c0_i32, %c0_i32_0 : i32, i32
  }
  func.func @transform_4(%arg0: i32) -> (i32, i32, i32) {
    %c0_i32 = arith.constant 0 : i32
    %c0_i32_0 = arith.constant 0 : i32
    %c0_i32_1 = arith.constant 0 : i32
    return %arg0, %c0_i32, %c0_i32_0 : i32, i32, i32
  }
}

module attributes {stable_mosaic.version = 11 : i64} {
  func.func @_conv_pool_relu_kernel(%arg0: i32, %arg1: memref<1x8x160xf32, #tpu.memory_space<vmem>>, %arg2: memref<1x8x160xf32, #tpu.memory_space<vmem>>, %arg3: memref<6x160x224xbf16, #tpu.memory_space<vmem>>, %arg4: memref<1x224xf32, #tpu.memory_space<vmem>>, %arg5: memref<1x7x224xf32, #tpu.memory_space<vmem>>) attributes {dimension_semantics = [#tpu.dimension_semantics<parallel>], iteration_bounds = array<i64: 2>, scalar_prefetch = 0 : i64, scratch_operands = 0 : i64, tpu.core_type = #tpu.core_type<tc>, window_params = [{transform_indices = @transform_0, window_bounds = array<i64: 1, 8, 160>}, {transform_indices = @transform_1, window_bounds = array<i64: 1, 8, 160>}, {pipeline_mode = #tpu.pipeline_mode<synchronous>, transform_indices = @transform_2, window_bounds = array<i64: 6, 160, 224>}, {pipeline_mode = #tpu.pipeline_mode<synchronous>, transform_indices = @transform_3, window_bounds = array<i64: 1, 224>}, {transform_indices = @transform_4, window_bounds = array<i64: 1, 7, 224>}]} {
    %c0 = arith.constant 0 : index
    %c0_0 = arith.constant 0 : index
    %c0_1 = arith.constant 0 : index
    %0 = vector.load %arg1[%c0, %c0_0, %c0_1] : memref<1x8x160xf32, #tpu.memory_space<vmem>>, vector<1x8x160xf32>
    %1 = vector.shape_cast %0 : vector<1x8x160xf32> to vector<8x160xf32>
    %c0_2 = arith.constant 0 : index
    %c0_3 = arith.constant 0 : index
    %c0_4 = arith.constant 0 : index
    %2 = vector.load %arg2[%c0_2, %c0_3, %c0_4] : memref<1x8x160xf32, #tpu.memory_space<vmem>>, vector<1x8x160xf32>
    %3 = vector.shape_cast %2 : vector<1x8x160xf32> to vector<8x160xf32>
    %4 = vector.extract_strided_slice %1 {offsets = [0, 0], sizes = [7, 160], strides = [1, 1]} : vector<8x160xf32> to vector<7x160xf32>
    %5 = arith.truncf %4 : vector<7x160xf32> to vector<7x160xbf16>
    %c0_5 = arith.constant 0 : index
    %c0_6 = arith.constant 0 : index
    %c0_7 = arith.constant 0 : index
    %6 = vector.load %arg3[%c0_5, %c0_6, %c0_7] : memref<6x160x224xbf16, #tpu.memory_space<vmem>>, vector<1x160x224xbf16>
    %7 = vector.shape_cast %6 : vector<1x160x224xbf16> to vector<160x224xbf16>
    %cst = arith.constant dense<0.000000e+00> : vector<7x224xf32>
    %8 = tpu.matmul %5, %7, %cst {dimension_numbers = #tpu.dot_dimension_numbers<[1], [0], [0], [1], [0, 0, 1, 1], [], []>} : vector<7x160xbf16>, vector<160x224xbf16>, vector<7x224xf32> -> vector<7x224xf32>
    %9 = vector.extract_strided_slice %3 {offsets = [0, 0], sizes = [7, 160], strides = [1, 1]} : vector<8x160xf32> to vector<7x160xf32>
    %10 = arith.truncf %9 : vector<7x160xf32> to vector<7x160xbf16>
    %c1 = arith.constant 1 : index
    %c0_8 = arith.constant 0 : index
    %c0_9 = arith.constant 0 : index
    %11 = vector.load %arg3[%c1, %c0_8, %c0_9] : memref<6x160x224xbf16, #tpu.memory_space<vmem>>, vector<1x160x224xbf16>
    %12 = vector.shape_cast %11 : vector<1x160x224xbf16> to vector<160x224xbf16>
    %cst_10 = arith.constant dense<0.000000e+00> : vector<7x224xf32>
    %13 = tpu.matmul %10, %12, %cst_10 {dimension_numbers = #tpu.dot_dimension_numbers<[1], [0], [0], [1], [0, 0, 1, 1], [], []>} : vector<7x160xbf16>, vector<160x224xbf16>, vector<7x224xf32> -> vector<7x224xf32>
    %14 = arith.addf %8, %13 : vector<7x224xf32>
    %15 = vector.extract_strided_slice %1 {offsets = [1, 0], sizes = [7, 160], strides = [1, 1]} : vector<8x160xf32> to vector<7x160xf32>
    %16 = arith.truncf %15 : vector<7x160xf32> to vector<7x160xbf16>
    %c2 = arith.constant 2 : index
    %c0_11 = arith.constant 0 : index
    %c0_12 = arith.constant 0 : index
    %17 = vector.load %arg3[%c2, %c0_11, %c0_12] : memref<6x160x224xbf16, #tpu.memory_space<vmem>>, vector<1x160x224xbf16>
    %18 = vector.shape_cast %17 : vector<1x160x224xbf16> to vector<160x224xbf16>
    %cst_13 = arith.constant dense<0.000000e+00> : vector<7x224xf32>
    %19 = tpu.matmul %16, %18, %cst_13 {dimension_numbers = #tpu.dot_dimension_numbers<[1], [0], [0], [1], [0, 0, 1, 1], [], []>} : vector<7x160xbf16>, vector<160x224xbf16>, vector<7x224xf32> -> vector<7x224xf32>
    %20 = arith.addf %14, %19 : vector<7x224xf32>
    %21 = vector.extract_strided_slice %1 {offsets = [0, 0], sizes = [7, 160], strides = [1, 1]} : vector<8x160xf32> to vector<7x160xf32>
    %22 = arith.truncf %21 : vector<7x160xf32> to vector<7x160xbf16>
    %c3 = arith.constant 3 : index
    %c0_14 = arith.constant 0 : index
    %c0_15 = arith.constant 0 : index
    %23 = vector.load %arg3[%c3, %c0_14, %c0_15] : memref<6x160x224xbf16, #tpu.memory_space<vmem>>, vector<1x160x224xbf16>
    %24 = vector.shape_cast %23 : vector<1x160x224xbf16> to vector<160x224xbf16>
    %cst_16 = arith.constant dense<0.000000e+00> : vector<7x224xf32>
    %25 = tpu.matmul %22, %24, %cst_16 {dimension_numbers = #tpu.dot_dimension_numbers<[1], [0], [0], [1], [0, 0, 1, 1], [], []>} : vector<7x160xbf16>, vector<160x224xbf16>, vector<7x224xf32> -> vector<7x224xf32>
    %26 = vector.extract_strided_slice %3 {offsets = [0, 0], sizes = [7, 160], strides = [1, 1]} : vector<8x160xf32> to vector<7x160xf32>
    %27 = arith.truncf %26 : vector<7x160xf32> to vector<7x160xbf16>
    %c4 = arith.constant 4 : index
    %c0_17 = arith.constant 0 : index
    %c0_18 = arith.constant 0 : index
    %28 = vector.load %arg3[%c4, %c0_17, %c0_18] : memref<6x160x224xbf16, #tpu.memory_space<vmem>>, vector<1x160x224xbf16>
    %29 = vector.shape_cast %28 : vector<1x160x224xbf16> to vector<160x224xbf16>
    %cst_19 = arith.constant dense<0.000000e+00> : vector<7x224xf32>
    %30 = tpu.matmul %27, %29, %cst_19 {dimension_numbers = #tpu.dot_dimension_numbers<[1], [0], [0], [1], [0, 0, 1, 1], [], []>} : vector<7x160xbf16>, vector<160x224xbf16>, vector<7x224xf32> -> vector<7x224xf32>
    %31 = arith.addf %25, %30 : vector<7x224xf32>
    %32 = vector.extract_strided_slice %1 {offsets = [1, 0], sizes = [7, 160], strides = [1, 1]} : vector<8x160xf32> to vector<7x160xf32>
    %33 = arith.truncf %32 : vector<7x160xf32> to vector<7x160xbf16>
    %c5 = arith.constant 5 : index
    %c0_20 = arith.constant 0 : index
    %c0_21 = arith.constant 0 : index
    %34 = vector.load %arg3[%c5, %c0_20, %c0_21] : memref<6x160x224xbf16, #tpu.memory_space<vmem>>, vector<1x160x224xbf16>
    %35 = vector.shape_cast %34 : vector<1x160x224xbf16> to vector<160x224xbf16>
    %cst_22 = arith.constant dense<0.000000e+00> : vector<7x224xf32>
    %36 = tpu.matmul %33, %35, %cst_22 {dimension_numbers = #tpu.dot_dimension_numbers<[1], [0], [0], [1], [0, 0, 1, 1], [], []>} : vector<7x160xbf16>, vector<160x224xbf16>, vector<7x224xf32> -> vector<7x224xf32>
    %37 = arith.addf %31, %36 : vector<7x224xf32>
    %38 = arith.maximumf %20, %37 : vector<7x224xf32>
    %39 = vector.extract_strided_slice %3 {offsets = [0, 0], sizes = [7, 160], strides = [1, 1]} : vector<8x160xf32> to vector<7x160xf32>
    %40 = arith.truncf %39 : vector<7x160xf32> to vector<7x160xbf16>
    %c0_23 = arith.constant 0 : index
    %c0_24 = arith.constant 0 : index
    %c0_25 = arith.constant 0 : index
    %41 = vector.load %arg3[%c0_23, %c0_24, %c0_25] : memref<6x160x224xbf16, #tpu.memory_space<vmem>>, vector<1x160x224xbf16>
    %42 = vector.shape_cast %41 : vector<1x160x224xbf16> to vector<160x224xbf16>
    %cst_26 = arith.constant dense<0.000000e+00> : vector<7x224xf32>
    %43 = tpu.matmul %40, %42, %cst_26 {dimension_numbers = #tpu.dot_dimension_numbers<[1], [0], [0], [1], [0, 0, 1, 1], [], []>} : vector<7x160xbf16>, vector<160x224xbf16>, vector<7x224xf32> -> vector<7x224xf32>
    %44 = vector.extract_strided_slice %1 {offsets = [1, 0], sizes = [7, 160], strides = [1, 1]} : vector<8x160xf32> to vector<7x160xf32>
    %45 = arith.truncf %44 : vector<7x160xf32> to vector<7x160xbf16>
    %c1_27 = arith.constant 1 : index
    %c0_28 = arith.constant 0 : index
    %c0_29 = arith.constant 0 : index
    %46 = vector.load %arg3[%c1_27, %c0_28, %c0_29] : memref<6x160x224xbf16, #tpu.memory_space<vmem>>, vector<1x160x224xbf16>
    %47 = vector.shape_cast %46 : vector<1x160x224xbf16> to vector<160x224xbf16>
    %cst_30 = arith.constant dense<0.000000e+00> : vector<7x224xf32>
    %48 = tpu.matmul %45, %47, %cst_30 {dimension_numbers = #tpu.dot_dimension_numbers<[1], [0], [0], [1], [0, 0, 1, 1], [], []>} : vector<7x160xbf16>, vector<160x224xbf16>, vector<7x224xf32> -> vector<7x224xf32>
    %49 = arith.addf %43, %48 : vector<7x224xf32>
    %50 = vector.extract_strided_slice %3 {offsets = [1, 0], sizes = [7, 160], strides = [1, 1]} : vector<8x160xf32> to vector<7x160xf32>
    %51 = arith.truncf %50 : vector<7x160xf32> to vector<7x160xbf16>
    %c2_31 = arith.constant 2 : index
    %c0_32 = arith.constant 0 : index
    %c0_33 = arith.constant 0 : index
    %52 = vector.load %arg3[%c2_31, %c0_32, %c0_33] : memref<6x160x224xbf16, #tpu.memory_space<vmem>>, vector<1x160x224xbf16>
    %53 = vector.shape_cast %52 : vector<1x160x224xbf16> to vector<160x224xbf16>
    %cst_34 = arith.constant dense<0.000000e+00> : vector<7x224xf32>
    %54 = tpu.matmul %51, %53, %cst_34 {dimension_numbers = #tpu.dot_dimension_numbers<[1], [0], [0], [1], [0, 0, 1, 1], [], []>} : vector<7x160xbf16>, vector<160x224xbf16>, vector<7x224xf32> -> vector<7x224xf32>
    %55 = arith.addf %49, %54 : vector<7x224xf32>
    %56 = arith.maximumf %38, %55 : vector<7x224xf32>
    %57 = vector.extract_strided_slice %3 {offsets = [0, 0], sizes = [7, 160], strides = [1, 1]} : vector<8x160xf32> to vector<7x160xf32>
    %58 = arith.truncf %57 : vector<7x160xf32> to vector<7x160xbf16>
    %c3_35 = arith.constant 3 : index
    %c0_36 = arith.constant 0 : index
    %c0_37 = arith.constant 0 : index
    %59 = vector.load %arg3[%c3_35, %c0_36, %c0_37] : memref<6x160x224xbf16, #tpu.memory_space<vmem>>, vector<1x160x224xbf16>
    %60 = vector.shape_cast %59 : vector<1x160x224xbf16> to vector<160x224xbf16>
    %cst_38 = arith.constant dense<0.000000e+00> : vector<7x224xf32>
    %61 = tpu.matmul %58, %60, %cst_38 {dimension_numbers = #tpu.dot_dimension_numbers<[1], [0], [0], [1], [0, 0, 1, 1], [], []>} : vector<7x160xbf16>, vector<160x224xbf16>, vector<7x224xf32> -> vector<7x224xf32>
    %62 = vector.extract_strided_slice %1 {offsets = [1, 0], sizes = [7, 160], strides = [1, 1]} : vector<8x160xf32> to vector<7x160xf32>
    %63 = arith.truncf %62 : vector<7x160xf32> to vector<7x160xbf16>
    %c4_39 = arith.constant 4 : index
    %c0_40 = arith.constant 0 : index
    %c0_41 = arith.constant 0 : index
    %64 = vector.load %arg3[%c4_39, %c0_40, %c0_41] : memref<6x160x224xbf16, #tpu.memory_space<vmem>>, vector<1x160x224xbf16>
    %65 = vector.shape_cast %64 : vector<1x160x224xbf16> to vector<160x224xbf16>
    %cst_42 = arith.constant dense<0.000000e+00> : vector<7x224xf32>
    %66 = tpu.matmul %63, %65, %cst_42 {dimension_numbers = #tpu.dot_dimension_numbers<[1], [0], [0], [1], [0, 0, 1, 1], [], []>} : vector<7x160xbf16>, vector<160x224xbf16>, vector<7x224xf32> -> vector<7x224xf32>
    %67 = arith.addf %61, %66 : vector<7x224xf32>
    %68 = vector.extract_strided_slice %3 {offsets = [1, 0], sizes = [7, 160], strides = [1, 1]} : vector<8x160xf32> to vector<7x160xf32>
    %69 = arith.truncf %68 : vector<7x160xf32> to vector<7x160xbf16>
    %c5_43 = arith.constant 5 : index
    %c0_44 = arith.constant 0 : index
    %c0_45 = arith.constant 0 : index
    %70 = vector.load %arg3[%c5_43, %c0_44, %c0_45] : memref<6x160x224xbf16, #tpu.memory_space<vmem>>, vector<1x160x224xbf16>
    %71 = vector.shape_cast %70 : vector<1x160x224xbf16> to vector<160x224xbf16>
    %cst_46 = arith.constant dense<0.000000e+00> : vector<7x224xf32>
    %72 = tpu.matmul %69, %71, %cst_46 {dimension_numbers = #tpu.dot_dimension_numbers<[1], [0], [0], [1], [0, 0, 1, 1], [], []>} : vector<7x160xbf16>, vector<160x224xbf16>, vector<7x224xf32> -> vector<7x224xf32>
    %73 = arith.addf %67, %72 : vector<7x224xf32>
    %74 = arith.maximumf %56, %73 : vector<7x224xf32>
    %c0_47 = arith.constant 0 : index
    %c0_48 = arith.constant 0 : index
    %75 = vector.load %arg4[%c0_47, %c0_48] : memref<1x224xf32, #tpu.memory_space<vmem>>, vector<1x224xf32>
    %76 = vector.broadcast %75 : vector<1x224xf32> to vector<7x224xf32>
    %77 = arith.addf %74, %76 : vector<7x224xf32>
    %cst_49 = arith.constant 0.000000e+00 : f32
    %78 = vector.broadcast %cst_49 : f32 to vector<7x224xf32>
    %79 = arith.maximumf %77, %78 : vector<7x224xf32>
    %c0_50 = arith.constant 0 : index
    %c0_51 = arith.constant 0 : index
    %c0_52 = arith.constant 0 : index
    %80 = vector.load %arg5[%c0_50, %c0_51, %c0_52] : memref<1x7x224xf32, #tpu.memory_space<vmem>>, vector<1x7x224xf32>
    %81 = vector.shape_cast %80 : vector<1x7x224xf32> to vector<7x224xf32>
    %82 = vector.shape_cast %79 : vector<7x224xf32> to vector<1x7x224xf32>
    tpu.vector_store %arg5[%c0_50, %c0_51, %c0_52], %82 {strides = array<i32>} : memref<1x7x224xf32, #tpu.memory_space<vmem>>, vector<1x7x224xf32>,
    return
  }
  func.func @transform_0(%arg0: i32) -> (i32, i32, i32) {
    %c0_i32 = arith.constant 0 : i32
    %c0_i32_0 = arith.constant 0 : i32
    %c0_i32_1 = arith.constant 0 : i32
    return %arg0, %c0_i32, %c0_i32_0 : i32, i32, i32
  }
  func.func @transform_1(%arg0: i32) -> (i32, i32, i32) {
    %c0_i32 = arith.constant 0 : i32
    %c0_i32_0 = arith.constant 0 : i32
    %c0_i32_1 = arith.constant 0 : i32
    return %arg0, %c0_i32, %c0_i32_0 : i32, i32, i32
  }
  func.func @transform_2(%arg0: i32) -> (i32, i32, i32) {
    %c0_i32 = arith.constant 0 : i32
    %c0_i32_0 = arith.constant 0 : i32
    %c0_i32_1 = arith.constant 0 : i32
    %c0_i32_2 = arith.constant 0 : i32
    return %c0_i32, %c0_i32_0, %c0_i32_1 : i32, i32, i32
  }
  func.func @transform_3(%arg0: i32) -> (i32, i32) {
    %c0_i32 = arith.constant 0 : i32
    %c0_i32_0 = arith.constant 0 : i32
    %c0_i32_1 = arith.constant 0 : i32
    return %c0_i32, %c0_i32_0 : i32, i32
  }
  func.func @transform_4(%arg0: i32) -> (i32, i32, i32) {
    %c0_i32 = arith.constant 0 : i32
    %c0_i32_0 = arith.constant 0 : i32
    %c0_i32_1 = arith.constant 0 : i32
    return %arg0, %c0_i32, %c0_i32_0 : i32, i32, i32
  }
}

module attributes {stable_mosaic.version = 11 : i64} {
  func.func @_fc_fused_kernel(%arg0: i32, %arg1: memref<2x1568xf32, #tpu.memory_space<vmem>>, %arg2: memref<1568x128xbf16, #tpu.memory_space<vmem>>, %arg3: memref<1x128xf32, #tpu.memory_space<vmem>>, %arg4: memref<128x128xbf16, #tpu.memory_space<vmem>>, %arg5: memref<1x128xf32, #tpu.memory_space<vmem>>, %arg6: memref<2x128xf32, #tpu.memory_space<vmem>>) attributes {dimension_semantics = [#tpu.dimension_semantics<parallel>], iteration_bounds = array<i64: 1>, scalar_prefetch = 0 : i64, scratch_operands = 0 : i64, tpu.core_type = #tpu.core_type<tc>, window_params = [{transform_indices = @transform_0, window_bounds = array<i64: 2, 1568>}, {pipeline_mode = #tpu.pipeline_mode<synchronous>, transform_indices = @transform_1, window_bounds = array<i64: 1568, 128>}, {pipeline_mode = #tpu.pipeline_mode<synchronous>, transform_indices = @transform_2, window_bounds = array<i64: 1, 128>}, {pipeline_mode = #tpu.pipeline_mode<synchronous>, transform_indices = @transform_3, window_bounds = array<i64: 128, 128>}, {pipeline_mode = #tpu.pipeline_mode<synchronous>, transform_indices = @transform_4, window_bounds = array<i64: 1, 128>}, {transform_indices = @transform_5, window_bounds = array<i64: 2, 128>}]} {
    %c0 = arith.constant 0 : index
    %c0_0 = arith.constant 0 : index
    %0 = vector.load %arg1[%c0, %c0_0] : memref<2x1568xf32, #tpu.memory_space<vmem>>, vector<2x1568xf32>
    %1 = arith.truncf %0 : vector<2x1568xf32> to vector<2x1568xbf16>
    %c0_1 = arith.constant 0 : index
    %c0_2 = arith.constant 0 : index
    %2 = vector.load %arg2[%c0_1, %c0_2] : memref<1568x128xbf16, #tpu.memory_space<vmem>>, vector<1568x128xbf16>
    %cst = arith.constant dense<0.000000e+00> : vector<2x128xf32>
    %3 = tpu.matmul %1, %2, %cst {dimension_numbers = #tpu.dot_dimension_numbers<[1], [0], [0], [1], [0, 0, 1, 1], [], []>} : vector<2x1568xbf16>, vector<1568x128xbf16>, vector<2x128xf32> -> vector<2x128xf32>
    %c0_3 = arith.constant 0 : index
    %c0_4 = arith.constant 0 : index
    %4 = vector.load %arg3[%c0_3, %c0_4] : memref<1x128xf32, #tpu.memory_space<vmem>>, vector<1x128xf32>
    %5 = vector.broadcast %4 : vector<1x128xf32> to vector<2x128xf32>
    %6 = arith.addf %3, %5 : vector<2x128xf32>
    %cst_5 = arith.constant 0.000000e+00 : f32
    %7 = vector.broadcast %cst_5 : f32 to vector<2x128xf32>
    %8 = arith.maximumf %6, %7 : vector<2x128xf32>
    %9 = arith.truncf %8 : vector<2x128xf32> to vector<2x128xbf16>
    %c0_6 = arith.constant 0 : index
    %c0_7 = arith.constant 0 : index
    %10 = vector.load %arg4[%c0_6, %c0_7] : memref<128x128xbf16, #tpu.memory_space<vmem>>, vector<128x128xbf16>
    %cst_8 = arith.constant dense<0.000000e+00> : vector<2x128xf32>
    %11 = tpu.matmul %9, %10, %cst_8 {dimension_numbers = #tpu.dot_dimension_numbers<[1], [0], [0], [1], [0, 0, 1, 1], [], []>} : vector<2x128xbf16>, vector<128x128xbf16>, vector<2x128xf32> -> vector<2x128xf32>
    %c0_9 = arith.constant 0 : index
    %c0_10 = arith.constant 0 : index
    %12 = vector.load %arg5[%c0_9, %c0_10] : memref<1x128xf32, #tpu.memory_space<vmem>>, vector<1x128xf32>
    %13 = vector.broadcast %12 : vector<1x128xf32> to vector<2x128xf32>
    %14 = arith.addf %11, %13 : vector<2x128xf32>
    %c0_11 = arith.constant 0 : index
    %c0_12 = arith.constant 0 : index
    %15 = vector.load %arg6[%c0_11, %c0_12] : memref<2x128xf32, #tpu.memory_space<vmem>>, vector<2x128xf32>
    tpu.vector_store %arg6[%c0_11, %c0_12], %14 {strides = array<i32>} : memref<2x128xf32, #tpu.memory_space<vmem>>, vector<2x128xf32>,
    return
  }
  func.func @transform_0(%arg0: i32) -> (i32, i32) {
    %c0_i32 = arith.constant 0 : i32
    %c0_i32_0 = arith.constant 0 : i32
    return %arg0, %c0_i32 : i32, i32
  }
  func.func @transform_1(%arg0: i32) -> (i32, i32) {
    %c0_i32 = arith.constant 0 : i32
    %c0_i32_0 = arith.constant 0 : i32
    %c0_i32_1 = arith.constant 0 : i32
    return %c0_i32, %c0_i32_0 : i32, i32
  }
  func.func @transform_2(%arg0: i32) -> (i32, i32) {
    %c0_i32 = arith.constant 0 : i32
    %c0_i32_0 = arith.constant 0 : i32
    %c0_i32_1 = arith.constant 0 : i32
    return %c0_i32, %c0_i32_0 : i32, i32
  }
  func.func @transform_3(%arg0: i32) -> (i32, i32) {
    %c0_i32 = arith.constant 0 : i32
    %c0_i32_0 = arith.constant 0 : i32
    %c0_i32_1 = arith.constant 0 : i32
    return %c0_i32, %c0_i32_0 : i32, i32
  }
  func.func @transform_4(%arg0: i32) -> (i32, i32) {
    %c0_i32 = arith.constant 0 : i32
    %c0_i32_0 = arith.constant 0 : i32
    %c0_i32_1 = arith.constant 0 : i32
    return %c0_i32, %c0_i32_0 : i32, i32
  }
  func.func @transform_5(%arg0: i32) -> (i32, i32) {
    %c0_i32 = arith.constant 0 : i32
    %c0_i32_0 = arith.constant 0 : i32
    return %arg0, %c0_i32 : i32, i32
  }
}

</mosaic_0001>

<bundles_post_ra>
// kernel: my_model_forward.3
= control target key start
LH: loop header
LB: loop body
LE: loop exit
PB: predicated region body
PF: predicated region fallthrough
CT: control target
= control target key end

     0   :  { %9 = vsyncpa [#allocation3], 0  ;;  %s1583_s0 = inlined_call_operand.vmem [shape: f32[2,15,30], index: 0, kind: input, shape index: {}]   ;;  %s1584_s1 = inlined_call_operand.vmem [shape: f32[2,15,30], index: 1, kind: input, shape index: {}]   ;;  %s1585_s2 = inlined_call_operand.hbm [shape: bf16[6,30,140], index: 2, kind: input, shape index: {}]   ;;  %s1586_s3 = inlined_call_operand.hbm [shape: f32[1,140], index: 3, kind: input, shape index: {}]   ;;  %s1587_s4 = inlined_call_operand.vmem [shape: f32[2,14,140], index: 4, kind: output, shape index: {}]  }
   0x1   :  { %10 = vsyncpa [#allocation5], 0  ;;  %s1381_s15 = smov 0  }
   0x2 LB: > { %s1387_s16 = sadd.s32 4294967295, %s1349_s15   ;;  %p1113_p0 = scmp.ge.s32.totalorder %s1349_s15, 1  ;;  %s1349_s15 = sphi %s1381_s15, %s16_s15  }
   0x3   : > { %p141_p1 = scmp.lt.s32.totalorder %s1349_s15, 3  ;;  %s1351_s17 = smov [#allocation2]  }
   0x4   : > { %s153_s18 = sshll.u32 %s1351_s17, 4  ;;  %p1588_p3 = scmp.eq.s32.totalorder %s1387_s16, 0  ;;  %s154_s18 = int_to_ptr.vmem [resolvable:$true] %s153_s18 }
   0x5   : > { %p1391_p2 = pnand %p1113_p0, %p141_p1  ;;  %s1352_s20 = smov [#allocation4]  }
   0x6   : > { %s167_s21 = sshll.u32 %s1352_s20, 4  ;;  %s1279_s25 = scalar_lea.hbm %s1585_s2, 3072  ;;  %s1404_s21 = int_to_ptr.vmem [resolvable:$true] %s167_s21 }
   0x7   : > { %s1590_s19 = scalar_select %p1391_p2, 1, 0 }
   0x8   : > { %p1219_p4 = pneg %p1391_p2  ;;  %p1280_p6 = scmp.ne.s32.totalorder %s1585_s2, %s1279_s25 }
   0x9   : > { %p1286_p10 = scmp.lt.u32.totalorder %s1279_s25, %s1585_s2 }
   0xa   : > { %p1400_p5 = pnand %p1588_p3, %p1219_p4 }
   0xc   : > { %p1281_p7 = pneg %p1400_p5 }
   0xe   : > { %p1282_p8 = pnand %p1281_p7, %p1280_p6 }
  0x10   : > { %p1283_p9 = pneg %p1282_p8 }
  0x12   : > { %p1288_p11 = pnand %p1286_p10, %p1283_p9 }
  0x14   : > { %1291 = shalt.err (!%p1288_p11)
}
  0x15   : > { %s1292_s30 = scalar_lea.vmem %s154_s18, 3072  ;;  %p1300_p1 = scmp.lt.s32.totalorder %s154_s18, %s154_s18 }
  0x16   : > { %p1293_p12 = scmp.ne.s32.totalorder %s154_s18, %s1292_s30  ;;  %p1301_p4 = scmp.lt.s32.totalorder %s1292_s30, %s1292_s30 }
  0x18   : > { %p1295_p13 = pnand %p1293_p12, %p1281_p7  ;;  %p1302_p3 = por %p1301_p4, %p1300_p1 }
  0x1a   : > { %p1296_p0 = pneg %p1295_p13 }
  0x1c   : > { %p1303_p2 = pnand %p1302_p3, %p1296_p0 }
  0x1e   : > { %1306 = shalt.err (!%p1303_p2)
}
  0x1f   : > { %s1353_s5 = smov 128   ;;  %s1354_s6 = smov 8  }
  0x20   : > { %1222 = dma.hbm_to_vmem [thread:$0]  (!%p1400_p5), %s1585_s2, 3072, %s154_s18, [#allocation3], %s1353_s5, %s1353_s5, %s1354_s6  }
  0x21   : > { %s1307_s11 = scalar_lea.hbm %s1586_s3, 32 }
  0x22   : > { %p1308_p6 = scmp.ne.s32.totalorder %s1586_s3, %s1307_s11  ;;  %p1314_p8 = scmp.lt.u32.totalorder %s1307_s11, %s1586_s3 }
  0x24   : > { %p1310_p2 = pnand %p1308_p6, %p1281_p7 }
  0x26   : > { %p1311_p3 = pneg %p1310_p2 }
  0x28   : > { %p1316_p9 = pnand %p1314_p8, %p1311_p3 }
  0x2a   : > { %1319 = shalt.err (!%p1316_p9)
}
  0x2b   : > { %s1320_s18 = scalar_lea.vmem %s1404_s21, 32  ;;  %p1328_p13 = scmp.lt.s32.totalorder %s1404_s21, %s1404_s21 }
  0x2c   : > { %p1321_p10 = scmp.ne.s32.totalorder %s1404_s21, %s1320_s18  ;;  %p1329_p0 = scmp.lt.s32.totalorder %s1320_s18, %s1320_s18 }
  0x2e   : > { %p1323_p11 = pnand %p1321_p10, %p1281_p7  ;;  %p1330_p1 = por %p1329_p0, %p1328_p13 }
  0x30   : > { %p1324_p12 = pneg %p1323_p11 }
  0x32   : > { %p1331_p4 = pnand %p1330_p1, %p1324_p12 }
  0x34   : > { %1334 = shalt.err (!%p1331_p4)
}
  0x35   : > { %1225 = dma.hbm_to_vmem [thread:$0]  (!%p1400_p5), %s1586_s3, 32, %s1404_s21, [#allocation5]  }
  0x36   : > { %p1592_p6 = scmp.ne.s32.totalorder %s1590_s19, 0 }
  0x37   : > { %p1593_p2 = scmp.eq.s32.totalorder (!%p1592_p6), %s1387_s16, 0 }
  0x38   : > { %196 = sbr.rel (%p1592_p6) target bundleno = 357 (0x165), region = 36 }
  0x3f   : > { %1340 = dma.done.wait (%p1593_p2), [#allocation3], 3072   ;;  %p1594_p7 = pmov %p1593_p2 }
  0x40   : > { %p1595_p3 = pmov %p1593_p2 }
  0x41   : > { %1342 = vsyncadd (%p1594_p7), [#allocation3], 4294964224 }
  0x42   : > { %1344 = dma.done.wait (%p1595_p3), [#allocation5], 32   ;;  %p1596_p8 = pmov %p1593_p2 }
  0x43   : > { %p231_p9 = scmp.lt.s32.totalorder %s1387_s16, 1  ;;  %v1355_v0 = vmov 0   ;;  %v1470_v1 = vld [vmem:[#allocation2 + $0x24] ss:$8 sps:$4 sm:$0xff]   ;;  %v1480_v3 = vld [vmem:[#allocation2 + $0x20] ss:$8 sps:$4 sm:$0xff]   ;;  %v998_v57 = vlaneseq }
  0x44   : > { %1346 = vsyncadd (%p1596_p8), [#allocation5], 4294967264  ;;  %323 = vmatprep.mubr.bf16.mxu0 %v1355_v0  ;;  %555 = vmatprep.mubr.bf16.mxu1 %v1355_v0  ;;  %v1472_v2 = vld [vmem:[#allocation2 + $0x84] ss:$8 sps:$4 sm:$0xff]   ;;  %v1482_v4 = vld [vmem:[#allocation2 + $0x80] ss:$8 sps:$4 sm:$0xff]  }
  0x45   : > { %s1598_s16 = smov (!%p231_p9, %s1387_s16), 1  ;;  %291 = vmatprep.subr.bf16.mxu0 %v1470_v1  ;;  %vm284_vm0 = vcmask 1046528   ;;  %523 = vmatprep.subr.bf16.mxu1 %v1472_v2  ;;  %v1485_v5 = vld [vmem:[#allocation2 + $0x34] ss:$8 sps:$4 sm:$0x7f]   ;;  %vm280_vm1 = vcmask 244736  }
  0x46   : > { %s1176_s19 = sshll.u32 %s1598_s16, 4  ;;  %292 = vmatpush1.bf16.msra.mxu0 %v1480_v3  ;;  %524 = vmatpush1.bf16.msra.mxu1 %v1482_v4  ;;  %v1489_v6 = vld [vmem:[#allocation2 + $0x94] ss:$8 sps:$4 sm:$0x7f]   ;;  %v1503_v14 = vld [vmem:[#allocation2] ss:$8 sps:$4 sm:$0xff]  }
  0x47   : > { %s240_s24 = scalar_lea.vmem %s1584_s1, %s1176_s19  ;;  %1130 = vmatprep.subr.msk.bf16.mxu0 %vm284_vm0, %v1485_v5  ;;  %v1253_v8 = vld [vmem:[#allocation2 + $0x30] ss:$8 sps:$4 sm:$0x7f]   ;;  %1148 = vmatprep.subr.msk.bf16.mxu1 %vm284_vm0, %v1489_v6  ;;  %v1505_v15 = vld [vmem:[#allocation2 + $0x4] ss:$8 sps:$4 sm:$0xff]   ;;  %s235_s27 = scalar_lea.vmem %s1583_s0, %s1176_s19  ;;  %v999_v58 = vshrl.u32 %v998_v57, 7 }
  0x48   : > { %v249_v7 = vld [vmem:[%s240_s24] sm:$0xff]  ;;  %v1254_v9 = vld [vmem:[#allocation2 + $0x90] ss:$8 sps:$4 sm:$0x7f]   ;;  %v250_v10 = vld [vmem:[%s240_s24 + $0x8] sm:$0x7f] }
  0x49   : > { %v1496_v11 = vsel %vm284_vm0, %v1253_v8, 0  ;;  %v1499_v12 = vsel %vm284_vm0, %v1254_v9, 0  ;;  %v1501_v13 = vpack.c.bf16 %v250_v10, %v249_v7  ;;  %v1509_v16 = vld [vmem:[#allocation2 + $0x60] ss:$8 sps:$4 sm:$0xff]   ;;  %v1260_v17 = vld [vmem:[#allocation2 + $0x64] ss:$8 sps:$4 sm:$0xff]  }
  0x4a   : > { %294 = vmatpush1.bf16.msra.mxu0 %v1496_v11  ;;  %526 = vmatpush1.bf16.msra.mxu1 %v1499_v12  ;;  %v1512_v18 = vld [vmem:[#allocation2 + $0x14] ss:$8 sps:$4 sm:$0x7f]   ;;  %v1263_v19 = vld [vmem:[#allocation2 + $0x10] ss:$8 sps:$4 sm:$0x7f]  }
  0x4b   : > { %361 = vmatprep.subr.bf16.mxu0 %v1505_v15  ;;  %v1264_v20 = vld [vmem:[#allocation2 + $0x74] ss:$8 sps:$4 sm:$0x7f]   ;;  %590 = vmatprep.subr.bf16.mxu1 %v1260_v17  ;;  %v1266_v21 = vld [vmem:[#allocation2 + $0x70] ss:$8 sps:$4 sm:$0x7f]  }
  0x4c   : > { %v356_v22 = vsel %vm284_vm0, %v1263_v19, 0  ;;  %v585_v23 = vsel %vm284_vm0, %v1266_v21, 0  ;;  %v1269_v24 = vld [vmem:[#allocation2 + $0x44] ss:$8 sps:$4 sm:$0xff]   ;;  %v1267_v29 = vld [vmem:[#allocation2 + $0x40] ss:$8 sps:$4 sm:$0xff]  }
  0x4d   : > { %1131 = vmatmul.mubr.msk.bf16.vlgmr.msra.gmra.mrb[0].mxu0 %vm280_vm1, %v1501_v13  ;;  %1149 = vmatmul.mubr.msk.bf16.vlgmr.msra.gmra.mrb[0].mxu1 %vm280_vm1, %v1501_v13  ;;  %v247_v25 = vld [vmem:[%s235_s27] sm:$0xff]  ;;  %v248_v27 = vld [vmem:[%s235_s27 + $0x8] sm:$0x7f]  ;;  %v1273_v31 = vld [vmem:[#allocation2 + $0x54] ss:$8 sps:$4 sm:$0x7f]  }
  0x4e   : > { %362 = vmatpush1.bf16.msra.mxu0 %v1503_v14  ;;  %591 = vmatpush1.bf16.msra.mxu1 %v1509_v16  ;;  %v1272_v26 = vld [vmem:[#allocation2 + $0xa4] ss:$8 sps:$4 sm:$0xff]   ;;  %v251_v28 = vpack.c.bf16 %v248_v27, %v247_v25  ;;  %v1270_v30 = vld [vmem:[#allocation2 + $0xa0] ss:$8 sps:$4 sm:$0xff]   ;;  %v801_v41 = vshll.u32 %v1501_v13, 16  ;;  %v799_v42 = vshrl.u32 %v1501_v13, 16 }
  0x4f   : > { %1136 = vmatprep.subr.msk.bf16.mxu0 %vm284_vm0, %v1512_v18  ;;  %1154 = vmatprep.subr.msk.bf16.mxu1 %vm284_vm0, %v1264_v20  ;;  %v1275_v32 = vld [vmem:[#allocation2 + $0x50] ss:$8 sps:$4 sm:$0x7f]   ;;  %v1276_v33 = vld [vmem:[#allocation2 + $0xb4] ss:$8 sps:$4 sm:$0x7f]  }
  0x50   : > { %393 = vmatprep.mubr.bf16.mxu0 %v1355_v0  ;;  %622 = vmatprep.mubr.bf16.mxu1 %v1355_v0  ;;  %v1278_v34 = vld [vmem:[#allocation2 + $0xb0] ss:$8 sps:$4 sm:$0x7f]   ;;  %v411_v35 = vshll.u32 %v251_v28, 16  ;;  %v437_v36 = vsel %vm284_vm0, %v1275_v32, 0  ;;  %v409_v38 = vshrl.u32 %v251_v28, 16 }
  0x51   : > { %v657_v37 = vsel %vm284_vm0, %v1278_v34, 0  ;;  %v803_v43 = vrot.slane %v801_v41, 1  ;;  %v1000_v59 = vsub.s32 0, %v999_v58  ;;  %v996_v60 = vld [vmem:[#allocation4] sm:$0x3]  ;;  %v1004_v61 = vsub.s32 1, %v999_v58 }
  0x52   : > { %364 = vmatpush1.bf16.msra.mxu0 %v356_v22  ;;  %593 = vmatpush1.bf16.msra.mxu1 %v585_v23  ;;  %v413_v39 = vrot.slane %v411_v35, 1  ;;  %s1178_s28 = sshll.u32 %s1598_s16, 5  ;;  %vm1017_vm2 = vcmask 97280   ;;  %vm1020_vm3 = vcmask 95232  }
  0x53   : > { %442 = vmatprep.subr.bf16.mxu0 %v1269_v24  ;;  %662 = vmatprep.subr.bf16.mxu1 %v1272_v26  ;;  %v804_v44 = vor.u32 %v803_v43, %v799_v42  ;;  %s245_s5 = scalar_lea.vmem %s1587_s4, %s1178_s28 }
  0x54   : > { %v414_v40 = vor.u32 %v413_v39, %v409_v38 }
  0x59   : > { %1137 = vmatmul.mubr.msk.bf16.vlgmr.msra.gmra.mrb[0].mxu0 %vm280_vm1, %v251_v28  ;;  %1155 = vmatmul.mubr.msk.bf16.vlgmr.msra.gmra.mrb[0].mxu1 %vm280_vm1, %v251_v28 }
  0x5a   : > { %443 = vmatpush1.bf16.msra.mxu0 %v1267_v29  ;;  %663 = vmatpush1.bf16.msra.mxu1 %v1270_v30 }
  0x5b   : > { %1142 = vmatprep.subr.msk.bf16.mxu0 %vm284_vm0, %v1273_v31  ;;  %1160 = vmatprep.subr.msk.bf16.mxu1 %vm284_vm0, %v1276_v33 }
  0x5c   : > { %474 = vmatprep.mubr.bf16.mxu0 %v1355_v0  ;;  %694 = vmatprep.mubr.bf16.mxu1 %v1355_v0 }
  0x5e   : > { %445 = vmatpush1.bf16.msra.mxu0 %v437_v36  ;;  %665 = vmatpush1.bf16.msra.mxu1 %v657_v37 }
  0x5f   : > { %713 = vmatprep.subr.bf16.mxu0 %v1470_v1  ;;  %859 = vmatprep.subr.bf16.mxu1 %v1472_v2  ;;  %v1001_v1 = vrot.slane %v996_v60, %v1000_v59 }
  0x65   : > { %1143 = vmatmul.mubr.msk.bf16.vlgmr.msra.gmra.mrb[0].mxu0 %vm280_vm1, %v414_v40  ;;  %1161 = vmatmul.mubr.msk.bf16.vlgmr.msra.gmra.mrb[0].mxu1 %vm280_vm1, %v414_v40 }
  0x66   : > { %714 = vmatpush1.bf16.msra.mxu0 %v1480_v3  ;;  %860 = vmatpush1.bf16.msra.mxu1 %v1482_v4 }
  0x67   : > { %1162 = vmatprep.subr.msk.bf16.mxu0 %vm284_vm0, %v1485_v5  ;;  %1168 = vmatprep.subr.msk.bf16.mxu1 %vm284_vm0, %v1489_v6  ;;  %v1005_v5 = vrot.slane %v996_v60, %v1004_v61 }
  0x68   : > { %745 = vmatprep.mubr.bf16.mxu0 %v1355_v0  ;;  %891 = vmatprep.mubr.bf16.mxu1 %v1355_v0 }
  0x6a   : > { %716 = vmatpush1.bf16.msra.mxu0 %v1496_v11  ;;  %862 = vmatpush1.bf16.msra.mxu1 %v1499_v12 }
  0x6b   : > { %756 = vmatprep.subr.bf16.mxu0 %v1505_v15  ;;  %902 = vmatprep.subr.bf16.mxu1 %v1260_v17 }
  0x6d   : > { %1163 = vmatmul.mubr.msk.bf16.vlgmr.msra.gmra.mrb[4].mxu0 %vm280_vm1, %v414_v40  ;;  %1169 = vmatmul.mubr.msk.bf16.vlgmr.msra.gmra.mrb[4].mxu1 %vm280_vm1, %v414_v40 }
  0x6e   : > { %757 = vmatpush1.bf16.msra.mxu0 %v1503_v14  ;;  %903 = vmatpush1.bf16.msra.mxu1 %v1509_v16 }
  0x6f   : > { %1164 = vmatprep.subr.msk.bf16.mxu0 %vm284_vm0, %v1512_v18  ;;  %1170 = vmatprep.subr.msk.bf16.mxu1 %vm284_vm0, %v1264_v20 }
  0x70   : > { %788 = vmatprep.mubr.bf16.mxu0 %v1355_v0  ;;  %934 = vmatprep.mubr.bf16.mxu1 %v1355_v0 }
  0x72   : > { %759 = vmatpush1.bf16.msra.mxu0 %v356_v22  ;;  %905 = vmatpush1.bf16.msra.mxu1 %v585_v23 }
  0x73   : > { %808 = vmatprep.subr.bf16.mxu0 %v1269_v24  ;;  %945 = vmatprep.subr.bf16.mxu1 %v1272_v26 }
  0x79   : > { %1165 = vmatmul.mubr.msk.bf16.vlgmr.msra.gmra.mrb[4].mxu0 %vm280_vm1, %v1501_v13  ;;  %1171 = vmatmul.mubr.msk.bf16.vlgmr.msra.gmra.mrb[4].mxu1 %vm280_vm1, %v1501_v13 }
  0x7a   : > { %809 = vmatpush1.bf16.msra.mxu0 %v1267_v29  ;;  %946 = vmatpush1.bf16.msra.mxu1 %v1270_v30 }
  0x7b   : > { %1166 = vmatprep.subr.msk.bf16.mxu0 %vm284_vm0, %v1273_v31  ;;  %1172 = vmatprep.subr.msk.bf16.mxu1 %vm284_vm0, %v1276_v33 }
  0x7c   : > { %840 = vmatprep.mubr.bf16.mxu0 %v1355_v0  ;;  %977 = vmatprep.mubr.bf16.mxu1 %v1355_v0 }
  0x7e   : > { %811 = vmatpush1.bf16.msra.mxu0 %v437_v36  ;;  %948 = vmatpush1.bf16.msra.mxu1 %v657_v37 }
  0x85   : > { %1167 = vmatmul.mubr.msk.bf16.vlgmr.msra.gmra.mrb[4].mxu0 %vm280_vm1, %v804_v44  ;;  %1173 = vmatmul.mubr.msk.bf16.vlgmr.msra.gmra.mrb[4].mxu1 %vm280_vm1, %v804_v44 }
 0x138   : > { %v476_v45 = vpop.f32.mrb[0].mxu0  ;;  %v696_v46 = vpop.f32.mrb[0].mxu1 }
 0x139   : > { %v709_v47 = vmax.f32 %v476_v45, %v696_v46  ;;  %v478_v48 = vpop.f32.mrb[1].mxu0  ;;  %v698_v49 = vpop.f32.mrb[1].mxu1 }
 0x13a   : > { %v710_v50 = vmax.f32 %v478_v48, %v698_v49  ;;  %v480_v51 = vpop.f32.mrb[2].mxu0  ;;  %v700_v52 = vpop.f32.mrb[2].mxu1 }
 0x13b   : > { %v711_v53 = vmax.f32 %v480_v51, %v700_v52  ;;  %v482_v54 = vpop.f32.mrb[3].mxu0  ;;  %v702_v55 = vpop.f32.mrb[3].mxu1 }
 0x13c   : > { %v712_v56 = vmax.f32 %v482_v54, %v702_v55 }
 0x158   : > { %v842_v62 = vpop.f32.mrb[4].mxu0  ;;  %v979_v63 = vpop.f32.mrb[4].mxu1 }
 0x159   : > { %v855_v0 = vmax.f32 %v709_v47, %v842_v62  ;;  %v844_v2 = vpop.f32.mrb[5].mxu0  ;;  %v981_v3 = vpop.f32.mrb[5].mxu1 }
 0x15a   : > { %v856_v4 = vmax.f32 %v710_v50, %v844_v2  ;;  %v846_v6 = vpop.f32.mrb[6].mxu0  ;;  %v983_v7 = vpop.f32.mrb[6].mxu1 }
 0x15b   : > { %v992_v8 = vmax.f32 %v855_v0, %v979_v63  ;;  %v857_v9 = vmax.f32 %v711_v53, %v846_v6  ;;  %v848_v10 = vpop.f32.mrb[7].mxu0  ;;  %v985_v11 = vpop.f32.mrb[7].mxu1 }
 0x15c   : > { %v993_v12 = vmax.f32 %v856_v4, %v981_v3  ;;  %v858_v13 = vmax.f32 %v712_v56, %v848_v10 }
 0x15d   : > { %v1008_v14 = vadd.f32 %v1001_v1, %v992_v8  ;;  %v994_v15 = vmax.f32 %v857_v9, %v983_v7 }
 0x15e   : > { %v1009_v16 = vadd.f32 %v1005_v5, %v993_v12  ;;  %v995_v17 = vmax.f32 %v858_v13, %v985_v11 }
 0x15f   : > { %v1012_v18 = vmax.f32 %v1008_v14, 0.0  ;;  %v1010_v19 = vadd.f32 %v1001_v1, %v994_v15 }
 0x160   : > { %v1013_v20 = vmax.f32 %v1009_v16, 0.0  ;;  %v1011_v21 = vadd.f32 %v1005_v5, %v995_v17 }
 0x161   : > { %1016 = vst [vmem:[%s245_s5] sm:$0xff] %v1012_v18  ;;  %v1014_v22 = vmax.f32 %v1010_v19, 0.0 }
 0x162   : > { %1018 = vst.msk [vmem:[%s245_s5 + $0x8] sm:$0xff] %vm1017_vm2, %v1013_v20  ;;  %v1015_v23 = vmax.f32 %v1011_v21, 0.0 }
 0x163   : > { %1019 = vst [vmem:[%s245_s5 + $0x10] sm:$0x3f] %v1014_v22 }
 0x164   : > { %1021 = vst.msk [vmem:[%s245_s5 + $0x18] sm:$0x3f] %vm1020_vm3, %v1015_v23 }
 0x165 PF: > { %s16_s15 = sadd.s32 1, %s1349_s15  }
 0x166   : > { %p13_p5 = scmp.ge.s32.totalorder %s16_s15, 4  }
 0x168   :  { %15 = sbr.rel (!%p13_p5) target bundleno = 2 (0x2), region = 83 }
 0x16f   :  { %1043 = vsyncpa [#allocation3], 1 }
 0x170   :  { %1045 = vsyncpa [#allocation3 + $0x1], 1 }
 0x171   :  { %1046 = vsyncpa [#allocation5], 1 }

// kernel: my_model_forward.4
= control target key start
LH: loop header
LB: loop body
LE: loop exit
PB: predicated region body
PF: predicated region fallthrough
CT: control target
= control target key end

     0   :  { %s2086_s15 = smov 0   ;;  %s3012_s0 = inlined_call_operand.vmem [shape: f32[2,8,160], index: 0, kind: input, shape index: {}]   ;;  %s3013_s1 = inlined_call_operand.vmem [shape: f32[2,8,160], index: 1, kind: input, shape index: {}]   ;;  %s3014_s2 = inlined_call_operand.vmem [shape: bf16[6,160,224], index: 2, kind: input, shape index: {}]   ;;  %s3015_s3 = inlined_call_operand.vmem [shape: f32[1,224], index: 3, kind: input, shape index: {}]   ;;  %s3016_s4 = inlined_call_operand.vmem [shape: f32[2,7,224], index: 4, kind: output, shape index: {}]  }
   0x1 LB: > { %s1585_s16 = sadd.s32 4294967295, %s2059_s15   ;;  %p1589_p0 = scmp.ge.s32.totalorder %s2059_s15, 1  ;;  %s2059_s15 = sphi %s2086_s15, %s14_s15  }
   0x2   : > { %p172_p1 = scmp.lt.s32.totalorder %s2059_s15, 3 }
   0x4   : > { %p173_p2 = pnand %p1589_p0, %p172_p1 }
   0x6   : > { %176 = sbr.rel (%p173_p2) target bundleno = 476 (0x1dc), region = 36 }
   0xd   : > { %v2097_v0 = vld [vmem:[%s3014_s2 + $0xa4] ss:$8 sps:$4 sm:$0xff]   ;;  %v2108_v2 = vld [vmem:[%s3014_s2 + $0xa0] ss:$8 sps:$4 sm:$0xff]   ;;  %v2119_v4 = vld [vmem:[%s3014_s2 + $0xb4] ss:$8 sps:$4 sm:$0xff]  }
   0xe   : > { %v2102_v1 = vld [vmem:[%s3014_s2 + $0x284] ss:$8 sps:$4 sm:$0xff]   ;;  %372 = vmatprep.subr.bf16.mxu0 %v2097_v0  ;;  %v2113_v3 = vld [vmem:[%s3014_s2 + $0x280] ss:$8 sps:$4 sm:$0xff]   ;;  %v2126_v5 = vld [vmem:[%s3014_s2 + $0x294] ss:$8 sps:$4 sm:$0xff]  }
   0xf   : > { %880 = vmatprep.subr.bf16.mxu1 %v2102_v1  ;;  %373 = vmatpush1.bf16.msra.mxu0 %v2108_v2  ;;  %v2131_v6 = vld [vmem:[%s3014_s2 + $0xb0] ss:$8 sps:$4 sm:$0xff]   ;;  %v2143_v8 = vld [vmem:[%s3014_s2 + $0xc4] ss:$8 sps:$4 sm:$0xff]   ;;  %v2153_v10 = vld [vmem:[%s3014_s2 + $0xc0] ss:$8 sps:$4 sm:$0xff]  }
  0x10   : > { %881 = vmatpush1.bf16.msra.mxu1 %v2113_v3  ;;  %374 = vmatprep.subr.bf16.mxu0 %v2119_v4  ;;  %v2137_v7 = vld [vmem:[%s3014_s2 + $0x290] ss:$8 sps:$4 sm:$0xff]   ;;  %v2148_v9 = vld [vmem:[%s3014_s2 + $0x2a4] ss:$8 sps:$4 sm:$0xff]   ;;  %v2158_v11 = vld [vmem:[%s3014_s2 + $0x2a0] ss:$8 sps:$4 sm:$0xff]  }
  0x11   : > { %882 = vmatprep.subr.bf16.mxu1 %v2126_v5  ;;  %v2165_v12 = vld [vmem:[%s3014_s2 + $0xd4] ss:$8 sps:$4 sm:$0xff]   ;;  %v2177_v14 = vld [vmem:[%s3014_s2 + $0xd0] ss:$8 sps:$4 sm:$0xff]   ;;  %v2189_v16 = vld [vmem:[%s3014_s2 + $0xe4] ss:$8 sps:$4 sm:$0xff]  }
  0x12   : > { %v2172_v13 = vld [vmem:[%s3014_s2 + $0x2b4] ss:$8 sps:$4 sm:$0xff]   ;;  %v2184_v15 = vld [vmem:[%s3014_s2 + $0x2b0] ss:$8 sps:$4 sm:$0xff]   ;;  %p203_p3 = scmp.lt.s32.totalorder %s1585_s16, 1  ;;  %vm368_vm0 = vcmask 261120  }
  0x13   : > { %375 = vmatpush1.bf16.msra.mxu0 %v2131_v6  ;;  %v2198_v17 = vld [vmem:[%s3014_s2 + $0x2c4] ss:$8 sps:$4 sm:$0xff]   ;;  %v2203_v18 = vld [vmem:[%s3014_s2 + $0xe0] ss:$8 sps:$4 sm:$0xff]   ;;  %v2215_v20 = vld [vmem:[%s3014_s2 + $0xf4] ss:$8 sps:$4 sm:$0xff]  }
  0x14   : > { %883 = vmatpush1.bf16.msra.mxu1 %v2137_v7  ;;  %376 = vmatprep.subr.bf16.mxu0 %v2143_v8  ;;  %v2208_v19 = vld [vmem:[%s3014_s2 + $0x2c0] ss:$8 sps:$4 sm:$0xff]   ;;  %s3208_s16 = smov (!%p203_p3, %s1585_s16), 1  ;;  %v2224_v21 = vld [vmem:[%s3014_s2 + $0x2d4] ss:$8 sps:$4 sm:$0xff]   ;;  %vm1516_vm1 = vcmask 784384  }
  0x15   : > { %884 = vmatprep.subr.bf16.mxu1 %v2148_v9  ;;  %v2229_v22 = vld [vmem:[%s3014_s2 + $0xf0] ss:$8 sps:$4 sm:$0xff]   ;;  %v2241_v24 = vld [vmem:[%s3014_s2 + $0x104] ss:$8 sps:$4 sm:$0xff]   ;;  %s2243_s19 = sshll.u32 %s3208_s16, 4 }
  0x16   : > { %v2236_v23 = vld [vmem:[%s3014_s2 + $0x2d0] ss:$8 sps:$4 sm:$0xff]   ;;  %v2250_v25 = vld [vmem:[%s3014_s2 + $0x2e4] ss:$8 sps:$4 sm:$0xff]   ;;  %v2255_v26 = vld [vmem:[%s3014_s2 + $0x100] ss:$8 sps:$4 sm:$0xff]   ;;  %s2266_s27 = scalar_lea.vmem %s3013_s1, %s2243_s19  ;;  %s2442_s8 = scalar_lea.vmem %s3012_s0, %s2243_s19 }
  0x17   : > { %377 = vmatpush1.bf16.msra.mxu0 %v2153_v10  ;;  %v2260_v27 = vld [vmem:[%s3014_s2 + $0x2e0] ss:$8 sps:$4 sm:$0xff]   ;;  %v2273_v28 = vld [vmem:[%s3014_s2 + $0x114] ss:$8 sps:$4 sm:$0xff]   ;;  %v2286_v31 = vld [vmem:[%s3014_s2 + $0x110] ss:$8 sps:$4 sm:$0xff]   ;;  %s217_s29 = scalar_lea.vmem %s3016_s4, %s2243_s19 }
  0x18   : > { %885 = vmatpush1.bf16.msra.mxu1 %v2158_v11  ;;  %378 = vmatprep.subr.bf16.mxu0 %v2165_v12  ;;  %v2280_v29 = vld [vmem:[%s3014_s2 + $0x2f4] ss:$8 sps:$4 sm:$0xff]   ;;  %v222_v30 = vld [vmem:[%s2266_s27 + $0x8] sm:$0xff]  ;;  %v2295_v33 = vld [vmem:[%s3014_s2 + $0x2f0] ss:$8 sps:$4 sm:$0xff]  }
  0x19   : > { %886 = vmatprep.subr.bf16.mxu1 %v2172_v13  ;;  %v2288_v32 = vpack.c.bf16 %v222_v30, %v222_v30  ;;  %v2302_v34 = vld [vmem:[%s3014_s2 + $0x124] ss:$8 sps:$4 sm:$0xff]   ;;  %v2318_v36 = vld [vmem:[%s3014_s2 + $0x120] ss:$8 sps:$4 sm:$0xff]   ;;  %v2330_v38 = vld [vmem:[%s3014_s2 + $0x134] ss:$8 sps:$4 sm:$0xff]  }
  0x1a   : > { %v2307_v35 = vld [vmem:[%s3014_s2 + $0x304] ss:$8 sps:$4 sm:$0xff]   ;;  %v2323_v37 = vld [vmem:[%s3014_s2 + $0x300] ss:$8 sps:$4 sm:$0xff]   ;;  %v2335_v39 = vld [vmem:[%s3014_s2 + $0x314] ss:$8 sps:$4 sm:$0xff]  }
  0x1b   : > { %379 = vmatpush1.bf16.msra.mxu0 %v2177_v14  ;;  %1636 = vmatprep.mubr.msk.bf16.mxu0 %vm368_vm0, %v2288_v32  ;;  %v2340_v40 = vld [vmem:[%s3014_s2 + $0x130] ss:$8 sps:$4 sm:$0xff]   ;;  %v221_v42 = vld [vmem:[%s2266_s27] sm:$0xff]  ;;  %v2381_v48 = vld [vmem:[%s3014_s2 + $0x14] ss:$8 sps:$4 sm:$0xff]  }
  0x1c   : > { %887 = vmatpush1.bf16.msra.mxu1 %v2184_v15  ;;  %380 = vmatprep.subr.bf16.mxu0 %v2189_v16  ;;  %v2347_v41 = vld [vmem:[%s3014_s2 + $0x310] ss:$8 sps:$4 sm:$0xff]   ;;  %v2355_v43 = vld [vmem:[%s3014_s2 + $0x4] ss:$8 sps:$4 sm:$0xff]   ;;  %v2362_v45 = vpack.c.bf16 %v221_v42, %v221_v42  ;;  %v2369_v46 = vld [vmem:[%s3014_s2] ss:$8 sps:$4 sm:$0xff]  }
  0x1d   : > { %888 = vmatprep.subr.bf16.mxu1 %v2198_v17  ;;  %1759 = vmatprep.mubr.msk.bf16.mxu1 %vm368_vm0, %v2288_v32  ;;  %v2360_v44 = vld [vmem:[%s3014_s2 + $0x1e4] ss:$8 sps:$4 sm:$0xff]   ;;  %v2374_v47 = vld [vmem:[%s3014_s2 + $0x1e0] ss:$8 sps:$4 sm:$0xff]   ;;  %v2386_v49 = vld [vmem:[%s3014_s2 + $0x1f4] ss:$8 sps:$4 sm:$0xff]  }
  0x1e   : > { %3081 = vst [vmem:[#allocation2_spill] sm:$0xff] %v2362_v45  ;;  %v2395_v50 = vld [vmem:[%s3014_s2 + $0x10] ss:$8 sps:$4 sm:$0xff]   ;;  %v2407_v52 = vld [vmem:[%s3014_s2 + $0x24] ss:$8 sps:$4 sm:$0xff]  }
  0x1f   : > { %381 = vmatpush1.bf16.msra.mxu0 %v2203_v18  ;;  %v2400_v51 = vld [vmem:[%s3014_s2 + $0x1f0] ss:$8 sps:$4 sm:$0xff]   ;;  %v2412_v53 = vld [vmem:[%s3014_s2 + $0x204] ss:$8 sps:$4 sm:$0xff]   ;;  %v2419_v54 = vld [vmem:[%s3014_s2 + $0x20] ss:$8 sps:$4 sm:$0xff]  }
  0x20   : > { %889 = vmatpush1.bf16.msra.mxu1 %v2208_v19  ;;  %382 = vmatprep.subr.bf16.mxu0 %v2215_v20  ;;  %3082 = vst [vmem:[#allocation3_spill] sm:$0xff] %v2412_v53  ;;  %3083 = vst [vmem:[#allocation4_spill] sm:$0xff] %v2419_v54  ;;  %v2424_v55 = vld [vmem:[%s3014_s2 + $0x200] ss:$8 sps:$4 sm:$0xff]   ;;  %v2431_v56 = vld [vmem:[%s3014_s2 + $0x34] ss:$8 sps:$4 sm:$0xff]  }
  0x21   : > { %890 = vmatprep.subr.bf16.mxu1 %v2224_v21  ;;  %3084 = vst [vmem:[#allocation5_spill] sm:$0xff] %v2424_v55  ;;  %3085 = vst [vmem:[#allocation6_spill] sm:$0xff] %v2431_v56  ;;  %v2436_v57 = vld [vmem:[%s3014_s2 + $0x214] ss:$8 sps:$4 sm:$0xff]   ;;  %v2449_v58 = vld [vmem:[%s3014_s2 + $0x30] ss:$8 sps:$4 sm:$0xff]  }
  0x22   : > { %3086 = vst [vmem:[#allocation7_spill] sm:$0xff] %v2436_v57  ;;  %3087 = vst [vmem:[#allocation8_spill] sm:$0xff] %v2449_v58  ;;  %v2454_v59 = vld [vmem:[%s3014_s2 + $0x210] ss:$8 sps:$4 sm:$0xff]   ;;  %v2461_v60 = vld [vmem:[%s3014_s2 + $0x44] ss:$8 sps:$4 sm:$0xff]  }
  0x23   : > { %383 = vmatpush1.bf16.msra.mxu0 %v2229_v22  ;;  %3088 = vst [vmem:[#allocation9_spill] sm:$0xff] %v2454_v59  ;;  %3089 = vst [vmem:[#allocation10_spill] sm:$0xff] %v2461_v60  ;;  %v2466_v61 = vld [vmem:[%s3014_s2 + $0x224] ss:$8 sps:$4 sm:$0xff]   ;;  %v2472_v63 = vld [vmem:[%s3014_s2 + $0x40] ss:$8 sps:$4 sm:$0xff]  }
  0x24   : > { %891 = vmatpush1.bf16.msra.mxu1 %v2236_v23  ;;  %384 = vmatprep.subr.bf16.mxu0 %v2241_v24  ;;  %3090 = vst [vmem:[#allocation11_spill] sm:$0xff] %v2466_v61  ;;  %v220_v62 = vld [vmem:[%s2442_s8 + $0x8] sm:$0xff]  ;;  %3091 = vst [vmem:[#allocation12_spill] sm:$0xff] %v2472_v63 }
  0x25   : > { %892 = vmatprep.subr.bf16.mxu1 %v2250_v25  ;;  %v2474_v30 = vpack.c.bf16 %v220_v62, %v220_v62  ;;  %v2481_v42 = vld [vmem:[%s3014_s2 + $0x220] ss:$8 sps:$4 sm:$0xff]   ;;  %v2493_v62 = vld [vmem:[%s3014_s2 + $0x234] ss:$8 sps:$4 sm:$0xff]  }
  0x26   : > { %3092 = vst [vmem:[#allocation13_spill] sm:$0xff] %v2481_v42  ;;  %3094 = vst [vmem:[#allocation15_spill] sm:$0xff] %v2493_v62 }
  0x27   : > { %385 = vmatpush1.bf16.msra.mxu0 %v2255_v26 }
  0x28   : > { %893 = vmatpush1.bf16.msra.mxu1 %v2260_v27  ;;  %386 = vmatprep.subr.bf16.mxu0 %v2273_v28 }
  0x29   : > { %894 = vmatprep.subr.bf16.mxu1 %v2280_v29 }
  0x2b   : > { %387 = vmatpush1.bf16.msra.mxu0 %v2286_v31 }
  0x2c   : > { %895 = vmatpush1.bf16.msra.mxu1 %v2295_v33  ;;  %388 = vmatprep.subr.bf16.mxu0 %v2302_v34 }
  0x2d   : > { %896 = vmatprep.subr.bf16.mxu1 %v2307_v35 }
  0x2f   : > { %389 = vmatpush1.bf16.msra.mxu0 %v2318_v36 }
  0x30   : > { %897 = vmatpush1.bf16.msra.mxu1 %v2323_v37  ;;  %390 = vmatprep.subr.bf16.mxu0 %v2330_v38 }
  0x31   : > { %898 = vmatprep.subr.bf16.mxu1 %v2335_v39 }
  0x33   : > { %391 = vmatpush1.bf16.msra.mxu0 %v2340_v40 }
  0x34   : > { %899 = vmatpush1.bf16.msra.mxu1 %v2347_v41  ;;  %516 = vmatprep.subr.bf16.mxu0 %v2355_v43 }
  0x35   : > { %1021 = vmatprep.subr.bf16.mxu1 %v2360_v44 }
  0x36   : > { %405 = vmatmul.mubr.bf16.vlgmr.msra.gmra.mrb[0].mxu0 %v2362_v45 }
  0x37   : > { %913 = vmatmul.mubr.bf16.vlgmr.msra.gmra.mrb[0].mxu1 %v2362_v45  ;;  %517 = vmatpush1.bf16.msra.mxu0 %v2369_v46  ;;  %v2486_v45 = vld [vmem:[%s3014_s2 + $0x54] ss:$8 sps:$4 sm:$0xff]  }
  0x38   : > { %1022 = vmatpush1.bf16.msra.mxu1 %v2374_v47  ;;  %518 = vmatprep.subr.bf16.mxu0 %v2381_v48  ;;  %3093 = vst [vmem:[#allocation14_spill] sm:$0xff] %v2486_v45 }
  0x39   : > { %1023 = vmatprep.subr.bf16.mxu1 %v2386_v49  ;;  %1657 = vmatprep.mubr.msk.bf16.mxu0 %vm368_vm0, %v2474_v30 }
  0x3a   : > { %1780 = vmatprep.mubr.msk.bf16.mxu1 %vm368_vm0, %v2474_v30 }
  0x3b   : > { %519 = vmatpush1.bf16.msra.mxu0 %v2395_v50 }
  0x3c   : > { %1024 = vmatpush1.bf16.msra.mxu1 %v2400_v51  ;;  %520 = vmatprep.subr.bf16.mxu0 %v2407_v52 }
  0x3d   : > { %1025 = vmatprep.subr.bf16.mxu1 %v2412_v53  ;;  %v2625_v53 = vld [vmem:[%s3014_s2 + $0x140] ss:$8 sps:$4 sm:$0xff]  }
  0x3e   : > { %3112 = vst [vmem:[#allocation33_spill] sm:$0xff] %v2625_v53 }
  0x3f   : > { %521 = vmatpush1.bf16.msra.mxu0 %v2419_v54 }
  0x40   : > { %1026 = vmatpush1.bf16.msra.mxu1 %v2424_v55  ;;  %522 = vmatprep.subr.bf16.mxu0 %v2431_v56  ;;  %v2619_v56 = vld [vmem:[%s3014_s2 + $0x324] ss:$8 sps:$4 sm:$0xff]   ;;  %v585_v55 = vshrl.u32 %v2474_v30, 16 }
  0x41   : > { %1027 = vmatprep.subr.bf16.mxu1 %v2436_v57  ;;  %v2604_v57 = vld [vmem:[%s3014_s2 + $0x270] ss:$8 sps:$4 sm:$0xff]   ;;  %3111 = vst [vmem:[#allocation32_spill] sm:$0xff] %v2619_v56 }
  0x42   : > { %3109 = vst [vmem:[#allocation30_spill] sm:$0xff] %v2604_v57 }
  0x43   : > { %523 = vmatpush1.bf16.msra.mxu0 %v2449_v58  ;;  %v2521_v58 = vld [vmem:[%s3014_s2 + $0x244] ss:$8 sps:$4 sm:$0xff]  }
  0x44   : > { %1028 = vmatpush1.bf16.msra.mxu1 %v2454_v59  ;;  %524 = vmatprep.subr.bf16.mxu0 %v2461_v60  ;;  %v2502_v59 = vld [vmem:[%s3014_s2 + $0x50] ss:$8 sps:$4 sm:$0xff]   ;;  %v2514_v60 = vld [vmem:[%s3014_s2 + $0x64] ss:$8 sps:$4 sm:$0xff]   ;;  %3098 = vst [vmem:[#allocation19_spill] sm:$0xff] %v2521_v58 }
  0x45   : > { %1029 = vmatprep.subr.bf16.mxu1 %v2466_v61  ;;  %3095 = vst [vmem:[#allocation16_spill] sm:$0xff] %v2502_v59  ;;  %v2507_v61 = vld [vmem:[%s3014_s2 + $0x230] ss:$8 sps:$4 sm:$0xff]   ;;  %3097 = vst [vmem:[#allocation18_spill] sm:$0xff] %v2514_v60 }
  0x46   : > { %3096 = vst [vmem:[#allocation17_spill] sm:$0xff] %v2507_v61 }
  0x47   : > { %525 = vmatpush1.bf16.msra.mxu0 %v2472_v63  ;;  %v2526_v63 = vld [vmem:[%s3014_s2 + $0x60] ss:$8 sps:$4 sm:$0xff]  }
  0x48   : > { %1030 = vmatpush1.bf16.msra.mxu1 %v2481_v42  ;;  %526 = vmatprep.subr.bf16.mxu0 %v2486_v45  ;;  %3099 = vst [vmem:[#allocation20_spill] sm:$0xff] %v2526_v63  ;;  %v2531_v42 = vld [vmem:[%s3014_s2 + $0x240] ss:$8 sps:$4 sm:$0xff]   ;;  %v2545_v45 = vld [vmem:[%s3014_s2 + $0x254] ss:$8 sps:$4 sm:$0xff]  }
  0x49   : > { %1031 = vmatprep.subr.bf16.mxu1 %v2493_v62  ;;  %3100 = vst [vmem:[#allocation21_spill] sm:$0xff] %v2531_v42  ;;  %v2538_v62 = vld [vmem:[%s3014_s2 + $0x74] ss:$8 sps:$4 sm:$0xff]   ;;  %3102 = vst [vmem:[#allocation23_spill] sm:$0xff] %v2545_v45 }
  0x4a   : > { %3101 = vst [vmem:[#allocation22_spill] sm:$0xff] %v2538_v62 }
  0x4b   : > { %527 = vmatpush1.bf16.msra.mxu0 %v2502_v59  ;;  %v2550_v59 = vld [vmem:[%s3014_s2 + $0x70] ss:$8 sps:$4 sm:$0xff]  }
  0x4c   : > { %1032 = vmatpush1.bf16.msra.mxu1 %v2507_v61  ;;  %528 = vmatprep.subr.bf16.mxu0 %v2514_v60  ;;  %3103 = vst [vmem:[#allocation24_spill] sm:$0xff] %v2550_v59  ;;  %v2555_v61 = vld [vmem:[%s3014_s2 + $0x250] ss:$8 sps:$4 sm:$0xff]   ;;  %v2569_v60 = vld [vmem:[%s3014_s2 + $0x264] ss:$8 sps:$4 sm:$0xff]  }
  0x4d   : > { %1033 = vmatprep.subr.bf16.mxu1 %v2521_v58  ;;  %3104 = vst [vmem:[#allocation25_spill] sm:$0xff] %v2555_v61  ;;  %v2562_v58 = vld [vmem:[%s3014_s2 + $0x84] ss:$8 sps:$4 sm:$0xff]   ;;  %3106 = vst [vmem:[#allocation27_spill] sm:$0xff] %v2569_v60 }
  0x4e   : > { %3105 = vst [vmem:[#allocation26_spill] sm:$0xff] %v2562_v58 }
  0x4f   : > { %529 = vmatpush1.bf16.msra.mxu0 %v2526_v63  ;;  %v2574_v63 = vld [vmem:[%s3014_s2 + $0x80] ss:$8 sps:$4 sm:$0xff]  }
  0x50   : > { %1034 = vmatpush1.bf16.msra.mxu1 %v2531_v42  ;;  %530 = vmatprep.subr.bf16.mxu0 %v2538_v62  ;;  %3107 = vst [vmem:[#allocation28_spill] sm:$0xff] %v2574_v63  ;;  %v2579_v42 = vld [vmem:[%s3014_s2 + $0x260] ss:$8 sps:$4 sm:$0xff]   ;;  %v2593_v62 = vld [vmem:[%s3014_s2 + $0x274] ss:$8 sps:$4 sm:$0xff]  }
  0x51   : > { %1035 = vmatprep.subr.bf16.mxu1 %v2545_v45  ;;  %v2586_v45 = vld [vmem:[%s3014_s2 + $0x94] ss:$8 sps:$4 sm:$0xff]   ;;  %3108 = vst [vmem:[#allocation29_spill] sm:$0xff] %v2593_v62 }
  0x53   : > { %531 = vmatpush1.bf16.msra.mxu0 %v2550_v59  ;;  %v2598_v59 = vld [vmem:[%s3014_s2 + $0x90] ss:$8 sps:$4 sm:$0xff]  }
  0x54   : > { %1036 = vmatpush1.bf16.msra.mxu1 %v2555_v61  ;;  %532 = vmatprep.subr.bf16.mxu0 %v2562_v58  ;;  %v587_v61 = vshll.u32 %v2474_v30, 16  ;;  %v219_v58 = vld [vmem:[%s2442_s8] sm:$0xff] }
  0x55   : > { %1037 = vmatprep.subr.bf16.mxu1 %v2569_v60  ;;  %v2609_v60 = vld [vmem:[%s3014_s2 + $0x144] ss:$8 sps:$4 sm:$0xff]  }
  0x56   : > { %3110 = vst [vmem:[#allocation31_spill] sm:$0xff] %v2609_v60  ;;  %v589_v54 = vrot.slane %v587_v61, 1  ;;  %v2641_v61 = vld [vmem:[%s3014_s2 + $0x154] ss:$8 sps:$4 sm:$0xff]  }
  0x57   : > { %533 = vmatpush1.bf16.msra.mxu0 %v2574_v63  ;;  %v2627_v63 = vpack.c.bf16 %v219_v58, %v219_v58  ;;  %3114 = vst [vmem:[#allocation35_spill] sm:$0xff] %v2641_v61  ;;  %v2646_v58 = vld [vmem:[%s3014_s2 + $0x334] ss:$8 sps:$4 sm:$0xff]  }
  0x58   : > { %1038 = vmatpush1.bf16.msra.mxu1 %v2579_v42  ;;  %534 = vmatprep.subr.bf16.mxu0 %v2586_v45  ;;  %3115 = vst [vmem:[#allocation36_spill] sm:$0xff] %v2646_v58  ;;  %v2648_v30 = vor.u32 %v589_v54, %v585_v55  ;;  %v2669_v54 = vld [vmem:[%s3014_s2 + $0x164] ss:$8 sps:$4 sm:$0xff]  }
  0x59   : > { %1039 = vmatprep.subr.bf16.mxu1 %v2593_v62  ;;  %v2634_v62 = vld [vmem:[%s3014_s2 + $0x320] ss:$8 sps:$4 sm:$0xff]   ;;  %3118 = vst [vmem:[#allocation39_spill] sm:$0xff] %v2669_v54  ;;  %v2674_v55 = vld [vmem:[%s3014_s2 + $0x344] ss:$8 sps:$4 sm:$0xff]  }
  0x5a   : > { %3113 = vst [vmem:[#allocation34_spill] sm:$0xff] %v2634_v62  ;;  %3119 = vst [vmem:[#allocation40_spill] sm:$0xff] %v2674_v55 }
  0x5b   : > { %535 = vmatpush1.bf16.msra.mxu0 %v2598_v59 }
  0x5c   : > { %1040 = vmatpush1.bf16.msra.mxu1 %v2604_v57  ;;  %695 = vmatprep.subr.bf16.mxu0 %v2609_v60  ;;  %v2662_v60 = vld [vmem:[%s3014_s2 + $0x330] ss:$8 sps:$4 sm:$0xff]  }
  0x5d   : > { %1183 = vmatprep.subr.bf16.mxu1 %v2619_v56  ;;  %v2657_v56 = vld [vmem:[%s3014_s2 + $0x150] ss:$8 sps:$4 sm:$0xff]   ;;  %3117 = vst [vmem:[#allocation38_spill] sm:$0xff] %v2662_v60 }
  0x5e   : > { %549 = vmatmul.mubr.bf16.vlgmr.msra.gmra.mrb[0].mxu0 %v2627_v63  ;;  %3116 = vst [vmem:[#allocation37_spill] sm:$0xff] %v2657_v56 }
  0x5f   : > { %1054 = vmatmul.mubr.bf16.vlgmr.msra.gmra.mrb[0].mxu1 %v2627_v63  ;;  %696 = vmatpush1.bf16.msra.mxu0 %v2625_v53  ;;  %v579_v53 = vshrl.u32 %v2627_v63, 16 }
  0x60   : > { %1184 = vmatpush1.bf16.msra.mxu1 %v2634_v62  ;;  %697 = vmatprep.subr.bf16.mxu0 %v2641_v61  ;;  %v2690_v61 = vld [vmem:[%s3014_s2 + $0x340] ss:$8 sps:$4 sm:$0xff]   ;;  %v581_v62 = vshll.u32 %v2627_v63, 16 }
  0x61   : > { %1185 = vmatprep.subr.bf16.mxu1 %v2646_v58  ;;  %1698 = vmatprep.mubr.msk.bf16.mxu0 %vm368_vm0, %v2648_v30  ;;  %v2685_v58 = vld [vmem:[%s3014_s2 + $0x160] ss:$8 sps:$4 sm:$0xff]   ;;  %3121 = vst [vmem:[#allocation42_spill] sm:$0xff] %v2690_v61 }
  0x62   : > { %1821 = vmatprep.mubr.msk.bf16.mxu1 %vm368_vm0, %v2648_v30  ;;  %3120 = vst [vmem:[#allocation41_spill] sm:$0xff] %v2685_v58  ;;  %v583_v57 = vrot.slane %v581_v62, 1 }
  0x63   : > { %698 = vmatpush1.bf16.msra.mxu0 %v2657_v56  ;;  %v2697_v56 = vld [vmem:[%s3014_s2 + $0x174] ss:$8 sps:$4 sm:$0xff]  }
  0x64   : > { %1186 = vmatpush1.bf16.msra.mxu1 %v2662_v60  ;;  %699 = vmatprep.subr.bf16.mxu0 %v2669_v54  ;;  %3122 = vst [vmem:[#allocation43_spill] sm:$0xff] %v2697_v56  ;;  %v2702_v60 = vld [vmem:[%s3014_s2 + $0x354] ss:$8 sps:$4 sm:$0xff]   ;;  %v2709_v54 = vld [vmem:[%s3014_s2 + $0x170] ss:$8 sps:$4 sm:$0xff]   ;;  %v584_v63 = vor.u32 %v583_v57, %v579_v53 }
  0x65   : > { %1187 = vmatprep.subr.bf16.mxu1 %v2674_v55  ;;  %3123 = vst [vmem:[#allocation44_spill] sm:$0xff] %v2702_v60  ;;  %3124 = vst [vmem:[#allocation45_spill] sm:$0xff] %v2709_v54  ;;  %v2714_v55 = vld [vmem:[%s3014_s2 + $0x350] ss:$8 sps:$4 sm:$0xff]  }
  0x66   : > { %3125 = vst [vmem:[#allocation46_spill] sm:$0xff] %v2714_v55 }
  0x67   : > { %700 = vmatpush1.bf16.msra.mxu0 %v2685_v58  ;;  %v2721_v58 = vld [vmem:[%s3014_s2 + $0x184] ss:$8 sps:$4 sm:$0xff]  }
  0x68   : > { %1188 = vmatpush1.bf16.msra.mxu1 %v2690_v61  ;;  %701 = vmatprep.subr.bf16.mxu0 %v2697_v56  ;;  %3126 = vst [vmem:[#allocation47_spill] sm:$0xff] %v2721_v58  ;;  %v2726_v61 = vld [vmem:[%s3014_s2 + $0x364] ss:$8 sps:$4 sm:$0xff]   ;;  %v2733_v56 = vld [vmem:[%s3014_s2 + $0x180] ss:$8 sps:$4 sm:$0xff]  }
  0x69   : > { %1189 = vmatprep.subr.bf16.mxu1 %v2702_v60  ;;  %3127 = vst [vmem:[#allocation48_spill] sm:$0xff] %v2726_v61  ;;  %3128 = vst [vmem:[#allocation49_spill] sm:$0xff] %v2733_v56  ;;  %v2738_v60 = vld [vmem:[%s3014_s2 + $0x360] ss:$8 sps:$4 sm:$0xff]  }
  0x6a   : > { %3129 = vst [vmem:[#allocation50_spill] sm:$0xff] %v2738_v60 }
  0x6b   : > { %702 = vmatpush1.bf16.msra.mxu0 %v2709_v54  ;;  %v2745_v54 = vld [vmem:[%s3014_s2 + $0x194] ss:$8 sps:$4 sm:$0xff]  }
  0x6c   : > { %1190 = vmatpush1.bf16.msra.mxu1 %v2714_v55  ;;  %703 = vmatprep.subr.bf16.mxu0 %v2721_v58  ;;  %3130 = vst [vmem:[#allocation51_spill] sm:$0xff] %v2745_v54  ;;  %v2750_v55 = vld [vmem:[%s3014_s2 + $0x374] ss:$8 sps:$4 sm:$0xff]   ;;  %v2757_v58 = vld [vmem:[%s3014_s2 + $0x190] ss:$8 sps:$4 sm:$0xff]  }
  0x6d   : > { %1191 = vmatprep.subr.bf16.mxu1 %v2726_v61  ;;  %3131 = vst [vmem:[#allocation52_spill] sm:$0xff] %v2750_v55  ;;  %3132 = vst [vmem:[#allocation53_spill] sm:$0xff] %v2757_v58  ;;  %v2762_v61 = vld [vmem:[%s3014_s2 + $0x370] ss:$8 sps:$4 sm:$0xff]  }
  0x6e   : > { %3133 = vst [vmem:[#allocation54_spill] sm:$0xff] %v2762_v61 }
  0x6f   : > { %704 = vmatpush1.bf16.msra.mxu0 %v2733_v56  ;;  %v2769_v56 = vld [vmem:[%s3014_s2 + $0x1a4] ss:$8 sps:$4 sm:$0xff]  }
  0x70   : > { %1192 = vmatpush1.bf16.msra.mxu1 %v2738_v60  ;;  %705 = vmatprep.subr.bf16.mxu0 %v2745_v54  ;;  %3134 = vst [vmem:[#allocation55_spill] sm:$0xff] %v2769_v56  ;;  %v2774_v60 = vld [vmem:[%s3014_s2 + $0x384] ss:$8 sps:$4 sm:$0xff]   ;;  %v2781_v54 = vld [vmem:[%s3014_s2 + $0x1a0] ss:$8 sps:$4 sm:$0xff]   ;;  %v3191_v53 = vld [vmem:[#allocation49_spill] sm:$0xff] }
  0x71   : > { %1193 = vmatprep.subr.bf16.mxu1 %v2750_v55  ;;  %3135 = vst [vmem:[#allocation56_spill] sm:$0xff] %v2774_v60  ;;  %3136 = vst [vmem:[#allocation57_spill] sm:$0xff] %v2781_v54  ;;  %v2786_v55 = vld [vmem:[%s3014_s2 + $0x380] ss:$8 sps:$4 sm:$0xff]  }
  0x72   : > { %3137 = vst [vmem:[#allocation58_spill] sm:$0xff] %v2786_v55  ;;  %v3192_v57 = vld [vmem:[#allocation50_spill] sm:$0xff] }
  0x73   : > { %706 = vmatpush1.bf16.msra.mxu0 %v2757_v58  ;;  %v2793_v58 = vld [vmem:[%s3014_s2 + $0x1b4] ss:$8 sps:$4 sm:$0xff]  }
  0x74   : > { %1194 = vmatpush1.bf16.msra.mxu1 %v2762_v61  ;;  %707 = vmatprep.subr.bf16.mxu0 %v2769_v56  ;;  %3138 = vst [vmem:[#allocation59_spill] sm:$0xff] %v2793_v58  ;;  %v2798_v61 = vld [vmem:[%s3014_s2 + $0x394] ss:$8 sps:$4 sm:$0xff]   ;;  %v2805_v56 = vld [vmem:[%s3014_s2 + $0x1b0] ss:$8 sps:$4 sm:$0xff]  }
  0x75   : > { %1195 = vmatprep.subr.bf16.mxu1 %v2774_v60  ;;  %3139 = vst [vmem:[#allocation60_spill] sm:$0xff] %v2798_v61  ;;  %3140 = vst [vmem:[#allocation61_spill] sm:$0xff] %v2805_v56  ;;  %v2810_v60 = vld [vmem:[%s3014_s2 + $0x390] ss:$8 sps:$4 sm:$0xff]  }
  0x76   : > { %3141 = vst [vmem:[#allocation62_spill] sm:$0xff] %v2810_v60  ;;  %v3195_v62 = vld [vmem:[#allocation53_spill] sm:$0xff] }
  0x77   : > { %708 = vmatpush1.bf16.msra.mxu0 %v2781_v54  ;;  %v2817_v54 = vld [vmem:[%s3014_s2 + $0x1c4] ss:$8 sps:$4 sm:$0xff]  }
  0x78   : > { %1196 = vmatpush1.bf16.msra.mxu1 %v2786_v55  ;;  %709 = vmatprep.subr.bf16.mxu0 %v2793_v58  ;;  %3142 = vst [vmem:[#allocation63_spill] sm:$0xff] %v2817_v54  ;;  %v2822_v55 = vld [vmem:[%s3014_s2 + $0x3a4] ss:$8 sps:$4 sm:$0xff]   ;;  %v2835_v58 = vld [vmem:[%s3014_s2 + $0x3a0] ss:$8 sps:$4 sm:$0xff]  }
  0x79   : > { %1197 = vmatprep.subr.bf16.mxu1 %v2798_v61  ;;  %3143 = vst [vmem:[#allocation64_spill] sm:$0xff] %v2822_v55  ;;  %v2830_v61 = vld [vmem:[%s3014_s2 + $0x1c0] ss:$8 sps:$4 sm:$0xff]  }
  0x7b   : > { %710 = vmatpush1.bf16.msra.mxu0 %v2805_v56  ;;  %v2842_v56 = vld [vmem:[%s3014_s2 + $0x1d4] ss:$8 sps:$4 sm:$0xff]  }
  0x7c   : > { %1198 = vmatpush1.bf16.msra.mxu1 %v2810_v60  ;;  %711 = vmatprep.subr.bf16.mxu0 %v2817_v54  ;;  %v2847_v60 = vld [vmem:[%s3014_s2 + $0x3b4] ss:$8 sps:$4 sm:$0xff]   ;;  %v2860_v54 = vld [vmem:[%s3014_s2 + $0x3b0] ss:$8 sps:$4 sm:$0xff]  }
  0x7d   : > { %1199 = vmatprep.subr.bf16.mxu1 %v2822_v55  ;;  %v2855_v55 = vld [vmem:[%s3014_s2 + $0x1d0] ss:$8 sps:$4 sm:$0xff]  }
  0x7f   : > { %712 = vmatpush1.bf16.msra.mxu0 %v2830_v61 }
  0x80   : > { %1200 = vmatpush1.bf16.msra.mxu1 %v2835_v58  ;;  %713 = vmatprep.subr.bf16.mxu0 %v2842_v56 }
  0x81   : > { %1201 = vmatprep.subr.bf16.mxu1 %v2847_v60 }
  0x83   : > { %714 = vmatpush1.bf16.msra.mxu0 %v2855_v55 }
  0x84   : > { %1202 = vmatpush1.bf16.msra.mxu1 %v2860_v54  ;;  %1228 = vmatprep.subr.bf16.mxu0 %v2097_v0  ;;  %v3144_v0 = vld [vmem:[#allocation3_spill] sm:$0xff] }
  0x85   : > { %1372 = vmatprep.subr.bf16.mxu1 %v2102_v1  ;;  %v3145_v1 = vld [vmem:[#allocation4_spill] sm:$0xff] }
  0x86   : > { %728 = vmatmul.mubr.bf16.vlgmr.msra.gmra.mrb[0].mxu0 %v584_v63 }
  0x87   : > { %1216 = vmatmul.mubr.bf16.vlgmr.msra.gmra.mrb[0].mxu1 %v584_v63  ;;  %1229 = vmatpush1.bf16.msra.mxu0 %v2108_v2  ;;  %v3146_v2 = vld [vmem:[#allocation5_spill] sm:$0xff] }
  0x88   : > { %1373 = vmatpush1.bf16.msra.mxu1 %v2113_v3  ;;  %1230 = vmatprep.subr.bf16.mxu0 %v2119_v4  ;;  %v3147_v3 = vld [vmem:[#allocation6_spill] sm:$0xff]  ;;  %v3148_v4 = vld [vmem:[#allocation7_spill] sm:$0xff] }
  0x89   : > { %1374 = vmatprep.subr.bf16.mxu1 %v2126_v5  ;;  %1822 = vmatprep.mubr.msk.bf16.mxu0 %vm368_vm0, %v2648_v30  ;;  %v3149_v5 = vld [vmem:[#allocation8_spill] sm:$0xff] }
  0x8a   : > { %1825 = vmatprep.mubr.msk.bf16.mxu1 %vm368_vm0, %v2648_v30  ;;  %v3196_v30 = vld [vmem:[#allocation54_spill] sm:$0xff] }
  0x8b   : > { %1231 = vmatpush1.bf16.msra.mxu0 %v2131_v6  ;;  %v3150_v6 = vld [vmem:[#allocation9_spill] sm:$0xff] }
  0x8c   : > { %1375 = vmatpush1.bf16.msra.mxu1 %v2137_v7  ;;  %1232 = vmatprep.subr.bf16.mxu0 %v2143_v8  ;;  %v3151_v7 = vld [vmem:[#allocation10_spill] sm:$0xff]  ;;  %v3152_v8 = vld [vmem:[#allocation11_spill] sm:$0xff] }
  0x8d   : > { %1376 = vmatprep.subr.bf16.mxu1 %v2148_v9  ;;  %v3153_v9 = vld [vmem:[#allocation12_spill] sm:$0xff] }
  0x8f   : > { %1233 = vmatpush1.bf16.msra.mxu0 %v2153_v10  ;;  %v3154_v10 = vld [vmem:[#allocation13_spill] sm:$0xff] }
  0x90   : > { %1377 = vmatpush1.bf16.msra.mxu1 %v2158_v11  ;;  %1234 = vmatprep.subr.bf16.mxu0 %v2165_v12  ;;  %v3155_v11 = vld [vmem:[#allocation14_spill] sm:$0xff]  ;;  %v3156_v12 = vld [vmem:[#allocation15_spill] sm:$0xff] }
  0x91   : > { %1378 = vmatprep.subr.bf16.mxu1 %v2172_v13  ;;  %v3157_v13 = vld [vmem:[#allocation16_spill] sm:$0xff] }
  0x93   : > { %1235 = vmatpush1.bf16.msra.mxu0 %v2177_v14  ;;  %v3158_v14 = vld [vmem:[#allocation17_spill] sm:$0xff] }
  0x94   : > { %1379 = vmatpush1.bf16.msra.mxu1 %v2184_v15  ;;  %1236 = vmatprep.subr.bf16.mxu0 %v2189_v16  ;;  %v3159_v15 = vld [vmem:[#allocation18_spill] sm:$0xff]  ;;  %v3160_v16 = vld [vmem:[#allocation19_spill] sm:$0xff] }
  0x95   : > { %1380 = vmatprep.subr.bf16.mxu1 %v2198_v17  ;;  %v3161_v17 = vld [vmem:[#allocation20_spill] sm:$0xff] }
  0x97   : > { %1237 = vmatpush1.bf16.msra.mxu0 %v2203_v18  ;;  %v3162_v18 = vld [vmem:[#allocation21_spill] sm:$0xff] }
  0x98   : > { %1381 = vmatpush1.bf16.msra.mxu1 %v2208_v19  ;;  %1238 = vmatprep.subr.bf16.mxu0 %v2215_v20  ;;  %v3163_v19 = vld [vmem:[#allocation22_spill] sm:$0xff]  ;;  %v3164_v20 = vld [vmem:[#allocation23_spill] sm:$0xff] }
  0x99   : > { %1382 = vmatprep.subr.bf16.mxu1 %v2224_v21  ;;  %v3165_v21 = vld [vmem:[#allocation24_spill] sm:$0xff] }
  0x9b   : > { %1239 = vmatpush1.bf16.msra.mxu0 %v2229_v22  ;;  %v3166_v22 = vld [vmem:[#allocation25_spill] sm:$0xff] }
  0x9c   : > { %1383 = vmatpush1.bf16.msra.mxu1 %v2236_v23  ;;  %1240 = vmatprep.subr.bf16.mxu0 %v2241_v24  ;;  %v3167_v23 = vld [vmem:[#allocation26_spill] sm:$0xff]  ;;  %v3168_v24 = vld [vmem:[#allocation27_spill] sm:$0xff] }
  0x9d   : > { %1384 = vmatprep.subr.bf16.mxu1 %v2250_v25  ;;  %v1319_v25 = vshll.u32 %v2288_v32, 16 }
  0x9f   : > { %1241 = vmatpush1.bf16.msra.mxu0 %v2255_v26  ;;  %v3169_v26 = vld [vmem:[#allocation28_spill] sm:$0xff] }
  0xa0   : > { %1385 = vmatpush1.bf16.msra.mxu1 %v2260_v27  ;;  %1242 = vmatprep.subr.bf16.mxu0 %v2273_v28  ;;  %v3170_v27 = vld [vmem:[#allocation29_spill] sm:$0xff]  ;;  %v1317_v28 = vshrl.u32 %v2288_v32, 16 }
  0xa1   : > { %1386 = vmatprep.subr.bf16.mxu1 %v2280_v29  ;;  %v1321_v29 = vrot.slane %v1319_v25, 1 }
  0xa3   : > { %1243 = vmatpush1.bf16.msra.mxu0 %v2286_v31  ;;  %v3171_v31 = vld [vmem:[#allocation30_spill] sm:$0xff] }
  0xa4   : > { %1387 = vmatpush1.bf16.msra.mxu1 %v2295_v33  ;;  %1244 = vmatprep.subr.bf16.mxu0 %v2302_v34  ;;  %v3172_v33 = vld [vmem:[#allocation31_spill] sm:$0xff]  ;;  %v3173_v34 = vld [vmem:[#allocation32_spill] sm:$0xff] }
  0xa5   : > { %1388 = vmatprep.subr.bf16.mxu1 %v2307_v35  ;;  %v1322_v35 = vor.u32 %v1321_v29, %v1317_v28 }
  0xa7   : > { %1245 = vmatpush1.bf16.msra.mxu0 %v2318_v36  ;;  %v3174_v36 = vld [vmem:[#allocation2_spill] sm:$0xff] }
  0xa8   : > { %1389 = vmatpush1.bf16.msra.mxu1 %v2323_v37  ;;  %1246 = vmatprep.subr.bf16.mxu0 %v2330_v38  ;;  %v3175_v37 = vld [vmem:[#allocation33_spill] sm:$0xff]  ;;  %v3176_v38 = vld [vmem:[#allocation34_spill] sm:$0xff] }
  0xa9   : > { %1390 = vmatprep.subr.bf16.mxu1 %v2335_v39  ;;  %v3177_v39 = vld [vmem:[#allocation35_spill] sm:$0xff] }
  0xab   : > { %1247 = vmatpush1.bf16.msra.mxu0 %v2340_v40  ;;  %v3179_v40 = vld [vmem:[#allocation37_spill] sm:$0xff] }
  0xac   : > { %1391 = vmatpush1.bf16.msra.mxu1 %v2347_v41  ;;  %1269 = vmatprep.subr.bf16.mxu0 %v2355_v43  ;;  %v3180_v41 = vld [vmem:[#allocation38_spill] sm:$0xff]  ;;  %v3181_v43 = vld [vmem:[#allocation39_spill] sm:$0xff] }
  0xad   : > { %1413 = vmatprep.subr.bf16.mxu1 %v2360_v44  ;;  %v3182_v44 = vld [vmem:[#allocation40_spill] sm:$0xff] }
  0xae   : > { %1261 = vmatmul.mubr.bf16.vlgmr.msra.gmra.mrb[4].mxu0 %v584_v63 }
  0xaf   : > { %1405 = vmatmul.mubr.bf16.vlgmr.msra.gmra.mrb[4].mxu1 %v584_v63  ;;  %1270 = vmatpush1.bf16.msra.mxu0 %v2369_v46  ;;  %v3184_v46 = vld [vmem:[#allocation42_spill] sm:$0xff]  ;;  %v3197_v63 = vld [vmem:[#allocation55_spill] sm:$0xff] }
  0xb0   : > { %1414 = vmatpush1.bf16.msra.mxu1 %v2374_v47  ;;  %1271 = vmatprep.subr.bf16.mxu0 %v2381_v48  ;;  %v3185_v47 = vld [vmem:[#allocation43_spill] sm:$0xff]  ;;  %v3186_v48 = vld [vmem:[#allocation44_spill] sm:$0xff] }
  0xb1   : > { %1415 = vmatprep.subr.bf16.mxu1 %v2386_v49  ;;  %1823 = vmatprep.mubr.msk.bf16.mxu0 %vm368_vm0, %v2288_v32  ;;  %v3187_v49 = vld [vmem:[#allocation45_spill] sm:$0xff] }
  0xb2   : > { %1826 = vmatprep.mubr.msk.bf16.mxu1 %vm368_vm0, %v2288_v32  ;;  %v3178_v32 = vld [vmem:[#allocation36_spill] sm:$0xff] }
  0xb3   : > { %1272 = vmatpush1.bf16.msra.mxu0 %v2395_v50  ;;  %v3188_v50 = vld [vmem:[#allocation46_spill] sm:$0xff] }
  0xb4   : > { %1416 = vmatpush1.bf16.msra.mxu1 %v2400_v51  ;;  %1273 = vmatprep.subr.bf16.mxu0 %v2407_v52  ;;  %v3189_v51 = vld [vmem:[#allocation47_spill] sm:$0xff]  ;;  %v3190_v52 = vld [vmem:[#allocation48_spill] sm:$0xff] }
  0xb5   : > { %1417 = vmatprep.subr.bf16.mxu1 %v3144_v0  ;;  %v3198_v0 = vld [vmem:[#allocation56_spill] sm:$0xff] }
  0xb7   : > { %1274 = vmatpush1.bf16.msra.mxu0 %v3145_v1  ;;  %v3199_v1 = vld [vmem:[#allocation57_spill] sm:$0xff] }
  0xb8   : > { %1418 = vmatpush1.bf16.msra.mxu1 %v3146_v2  ;;  %1275 = vmatprep.subr.bf16.mxu0 %v3147_v3  ;;  %v3200_v2 = vld [vmem:[#allocation58_spill] sm:$0xff]  ;;  %v3201_v3 = vld [vmem:[#allocation59_spill] sm:$0xff] }
  0xb9   : > { %1419 = vmatprep.subr.bf16.mxu1 %v3148_v4  ;;  %v3202_v4 = vld [vmem:[#allocation60_spill] sm:$0xff] }
  0xbb   : > { %1276 = vmatpush1.bf16.msra.mxu0 %v3149_v5  ;;  %v1313_v5 = vshll.u32 %v3174_v36, 16 }
  0xbc   : > { %1420 = vmatpush1.bf16.msra.mxu1 %v3150_v6  ;;  %1277 = vmatprep.subr.bf16.mxu0 %v3151_v7  ;;  %v3203_v6 = vld [vmem:[#allocation61_spill] sm:$0xff]  ;;  %v3204_v7 = vld [vmem:[#allocation62_spill] sm:$0xff] }
  0xbd   : > { %1421 = vmatprep.subr.bf16.mxu1 %v3152_v8  ;;  %v3205_v8 = vld [vmem:[#allocation63_spill] sm:$0xff] }
  0xbf   : > { %1278 = vmatpush1.bf16.msra.mxu0 %v3153_v9  ;;  %v3206_v9 = vld [vmem:[#allocation64_spill] sm:$0xff] }
  0xc0   : > { %1422 = vmatpush1.bf16.msra.mxu1 %v3154_v10  ;;  %1279 = vmatprep.subr.bf16.mxu0 %v3155_v11  ;;  %v1311_v10 = vshrl.u32 %v3174_v36, 16  ;;  %v1315_v11 = vrot.slane %v1313_v5, 1 }
  0xc1   : > { %1423 = vmatprep.subr.bf16.mxu1 %v3156_v12 }
  0xc2   : > { %v1316_v12 = vor.u32 %v1315_v11, %v1311_v10 }
  0xc3   : > { %1280 = vmatpush1.bf16.msra.mxu0 %v3157_v13 }
  0xc4   : > { %1424 = vmatpush1.bf16.msra.mxu1 %v3158_v14  ;;  %1281 = vmatprep.subr.bf16.mxu0 %v3159_v15 }
  0xc5   : > { %1425 = vmatprep.subr.bf16.mxu1 %v3160_v16 }
  0xc7   : > { %1282 = vmatpush1.bf16.msra.mxu0 %v3161_v17 }
  0xc8   : > { %1426 = vmatpush1.bf16.msra.mxu1 %v3162_v18  ;;  %1283 = vmatprep.subr.bf16.mxu0 %v3163_v19 }
  0xc9   : > { %1427 = vmatprep.subr.bf16.mxu1 %v3164_v20 }
  0xcb   : > { %1284 = vmatpush1.bf16.msra.mxu0 %v3165_v21 }
  0xcc   : > { %1428 = vmatpush1.bf16.msra.mxu1 %v3166_v22  ;;  %1285 = vmatprep.subr.bf16.mxu0 %v3167_v23 }
  0xcd   : > { %1429 = vmatprep.subr.bf16.mxu1 %v3168_v24 }
  0xcf   : > { %1286 = vmatpush1.bf16.msra.mxu0 %v3169_v26 }
  0xd0   : > { %1430 = vmatpush1.bf16.msra.mxu1 %v2579_v42  ;;  %1287 = vmatprep.subr.bf16.mxu0 %v2586_v45  ;;  %v3183_v45 = vld [vmem:[#allocation41_spill] sm:$0xff]  ;;  %v3194_v42 = vld [vmem:[#allocation52_spill] sm:$0xff] }
  0xd1   : > { %1431 = vmatprep.subr.bf16.mxu1 %v3170_v27 }
  0xd3   : > { %1288 = vmatpush1.bf16.msra.mxu0 %v2598_v59  ;;  %v3193_v59 = vld [vmem:[#allocation51_spill] sm:$0xff] }
  0xd4   : > { %1432 = vmatpush1.bf16.msra.mxu1 %v3171_v31  ;;  %1327 = vmatprep.subr.bf16.mxu0 %v3172_v33 }
  0xd5   : > { %1454 = vmatprep.subr.bf16.mxu1 %v3173_v34 }
  0xd6   : > { %1302 = vmatmul.mubr.bf16.vlgmr.msra.gmra.mrb[4].mxu0 %v3174_v36 }
  0xd7   : > { %1446 = vmatmul.mubr.bf16.vlgmr.msra.gmra.mrb[4].mxu1 %v3174_v36  ;;  %1328 = vmatpush1.bf16.msra.mxu0 %v3175_v37 }
  0xd8   : > { %1455 = vmatpush1.bf16.msra.mxu1 %v3176_v38  ;;  %1329 = vmatprep.subr.bf16.mxu0 %v3177_v39 }
  0xd9   : > { %1456 = vmatprep.subr.bf16.mxu1 %v3178_v32  ;;  %1824 = vmatprep.mubr.msk.bf16.mxu0 %vm368_vm0, %v1322_v35 }
  0xda   : > { %1827 = vmatprep.mubr.msk.bf16.mxu1 %vm368_vm0, %v1322_v35 }
  0xdb   : > { %1330 = vmatpush1.bf16.msra.mxu0 %v3179_v40 }
  0xdc   : > { %1457 = vmatpush1.bf16.msra.mxu1 %v3180_v41  ;;  %1331 = vmatprep.subr.bf16.mxu0 %v3181_v43 }
  0xdd   : > { %1458 = vmatprep.subr.bf16.mxu1 %v3182_v44 }
  0xdf   : > { %1332 = vmatpush1.bf16.msra.mxu0 %v3183_v45 }
  0xe0   : > { %1459 = vmatpush1.bf16.msra.mxu1 %v3184_v46  ;;  %1333 = vmatprep.subr.bf16.mxu0 %v3185_v47 }
  0xe1   : > { %1460 = vmatprep.subr.bf16.mxu1 %v3186_v48 }
  0xe3   : > { %1334 = vmatpush1.bf16.msra.mxu0 %v3187_v49 }
  0xe4   : > { %1461 = vmatpush1.bf16.msra.mxu1 %v3188_v50  ;;  %1335 = vmatprep.subr.bf16.mxu0 %v3189_v51 }
  0xe5   : > { %1462 = vmatprep.subr.bf16.mxu1 %v3190_v52 }
  0xe7   : > { %1336 = vmatpush1.bf16.msra.mxu0 %v3191_v53 }
  0xe8   : > { %1463 = vmatpush1.bf16.msra.mxu1 %v3192_v57  ;;  %1337 = vmatprep.subr.bf16.mxu0 %v3193_v59 }
  0xe9   : > { %1464 = vmatprep.subr.bf16.mxu1 %v3194_v42 }
  0xeb   : > { %1338 = vmatpush1.bf16.msra.mxu0 %v3195_v62 }
  0xec   : > { %1465 = vmatpush1.bf16.msra.mxu1 %v3196_v30  ;;  %1339 = vmatprep.subr.bf16.mxu0 %v3197_v63 }
  0xed   : > { %1466 = vmatprep.subr.bf16.mxu1 %v3198_v0 }
  0xef   : > { %1340 = vmatpush1.bf16.msra.mxu0 %v3199_v1 }
  0xf0   : > { %1467 = vmatpush1.bf16.msra.mxu1 %v3200_v2  ;;  %1341 = vmatprep.subr.bf16.mxu0 %v3201_v3 }
  0xf1   : > { %1468 = vmatprep.subr.bf16.mxu1 %v3202_v4 }
  0xf3   : > { %1342 = vmatpush1.bf16.msra.mxu0 %v3203_v6 }
  0xf4   : > { %1469 = vmatpush1.bf16.msra.mxu1 %v3204_v7  ;;  %1343 = vmatprep.subr.bf16.mxu0 %v3205_v8 }
  0xf5   : > { %1470 = vmatprep.subr.bf16.mxu1 %v3206_v9 }
  0xf7   : > { %1344 = vmatpush1.bf16.msra.mxu0 %v2830_v61 }
  0xf8   : > { %1471 = vmatpush1.bf16.msra.mxu1 %v2835_v58  ;;  %1345 = vmatprep.subr.bf16.mxu0 %v2842_v56  ;;  %v1501_v56 = vlaneseq }
  0xf9   : > { %1472 = vmatprep.subr.bf16.mxu1 %v2847_v60 }
  0xfa   : > { %v1502_v21 = vshrl.u32 %v1501_v56, 7 }
  0xfb   : > { %1346 = vmatpush1.bf16.msra.mxu0 %v2855_v55  ;;  %v1499_v55 = vld [vmem:[%s3015_s3] sm:$0x3] }
  0xfc   : > { %1473 = vmatpush1.bf16.msra.mxu1 %v2860_v54  ;;  %v1503_v60 = vsub.s32 0, %v1502_v21  ;;  %v1507_v54 = vsub.s32 1, %v1502_v21 }
  0xfe   : > { %1360 = vmatmul.mubr.bf16.vlgmr.msra.gmra.mrb[4].mxu0 %v1316_v12  ;;  %v1504_v25 = vrot.slane %v1499_v55, %v1503_v60  ;;  %v1508_v29 = vrot.slane %v1499_v55, %v1507_v54 }
  0xff   : > { %1487 = vmatmul.mubr.bf16.vlgmr.msra.gmra.mrb[4].mxu1 %v1316_v12 }
 0x159   : > { %v729_v13 = vpop.f32.mrb[0].mxu0 }
 0x15a   : > { %v1217_v14 = vpop.f32.mrb[0].mxu1  ;;  %v731_v16 = vpop.f32.mrb[1].mxu0 }
 0x15b   : > { %v1226_v15 = vmax.f32 %v729_v13, %v1217_v14  ;;  %v1219_v17 = vpop.f32.mrb[1].mxu1  ;;  %v733_v61 = vpop.f32.mrb[2].mxu0 }
 0x15c   : > { %v1227_v18 = vmax.f32 %v731_v16, %v1219_v17  ;;  %v1221_v19 = vpop.f32.mrb[2].mxu1  ;;  %v734_v58 = vpop.f32.mrb[3].mxu0 }
 0x15d   : > { %v1222_v20 = vpop.f32.mrb[3].mxu1 }
 0x1d1   : > { %v1361_v22 = vpop.f32.mrb[4].mxu0 }
 0x1d2   : > { %v1488_v23 = vpop.f32.mrb[4].mxu1  ;;  %v1370_v24 = vmax.f32 %v1226_v15, %v1361_v22  ;;  %v1363_v26 = vpop.f32.mrb[5].mxu0 }
 0x1d3   : > { %v1490_v27 = vpop.f32.mrb[5].mxu1  ;;  %v1371_v28 = vmax.f32 %v1227_v18, %v1363_v26  ;;  %v1365_v31 = vpop.f32.mrb[6].mxu0 }
 0x1d4   : > { %v1492_v33 = vpop.f32.mrb[6].mxu1  ;;  %v1497_v34 = vmax.f32 %v1370_v24, %v1488_v23  ;;  %v1366_v35 = vpop.f32.mrb[7].mxu0 }
 0x1d5   : > { %v1493_v36 = vpop.f32.mrb[7].mxu1  ;;  %v1498_v37 = vmax.f32 %v1371_v28, %v1490_v27 }
 0x1d6   : > { %v1511_v38 = vadd.f32 %v1504_v25, %v1497_v34 }
 0x1d7   : > { %v1512_v39 = vadd.f32 %v1508_v29, %v1498_v37 }
 0x1d8   : > { %v1513_v32 = vmax.f32 %v1511_v38, 0.0 }
 0x1d9   : > { %v1514_v40 = vmax.f32 %v1512_v39, 0.0 }
 0x1da   : > { %1515 = vst [vmem:[%s217_s29] sm:$0x7f] %v1513_v32 }
 0x1db   : > { %1517 = vst.msk [vmem:[%s217_s29 + $0x8] sm:$0x7f] %vm1516_vm1, %v1514_v40 }
 0x1dc PF: > { %s14_s15 = sadd.s32 1, %s2059_s15  }
 0x1dd   : > { %p11_p4 = scmp.ge.s32.totalorder %s14_s15, 4  }
 0x1df   :  { %13 = sbr.rel (!%p11_p4) target bundleno = 1 (0x1), region = 74 }

// kernel: my_model_forward.5
= control target key start
LH: loop header
LB: loop body
LE: loop exit
PB: predicated region body
PF: predicated region fallthrough
CT: control target
= control target key end

     0   :  { %v34_v28 = vlaneseq  ;;  %v1736_v36 = vmov 1983009808   ;;  %s2126_s0 = inlined_call_operand.vmem [shape: f32[2,1568], index: 0, kind: input, shape index: {}]   ;;  %s2127_s1 = inlined_call_operand.vmem [shape: bf16[1568,128], index: 1, kind: input, shape index: {}]   ;;  %s2128_s2 = inlined_call_operand.vmem [shape: f32[1,128], index: 2, kind: input, shape index: {}]   ;;  %s2129_s3 = inlined_call_operand.vmem [shape: bf16[128,128], index: 3, kind: input, shape index: {}]   ;;  %s2130_s4 = inlined_call_operand.vmem [shape: f32[1,128], index: 4, kind: input, shape index: {}]   ;;  %s2131_s5 = inlined_call_operand.hbm [shape: f32[2,128], index: 5, kind: output, shape index: {}]  }
   0x1   :  { %v1603_v0 = vld [vmem:[%s2127_s1 + $0x40] sm:$0xff]   ;;  %v1607_v4 = vld [vmem:[%s2127_s1 + $0x48] sm:$0xff]   ;;  %v1611_v8 = vld [vmem:[%s2127_s1 + $0x50] sm:$0xff]   ;;  %v32_v37 = vunpack.c.l.s4 %v1736_v36 }
   0x2   :  { %v1604_v1 = vld [vmem:[%s2127_s1] sm:$0xff]   ;;  %1427 = vmatprep.subr.bf16.mxu0 %v1603_v0  ;;  %v1608_v5 = vld [vmem:[%s2127_s1 + $0x8] sm:$0xff]   ;;  %v1612_v9 = vld [vmem:[%s2127_s1 + $0x10] sm:$0xff]   ;;  %v35_v33 = vshrl.u32 %v34_v28, 7 }
   0x3   :  { %v1605_v2 = vld [vmem:[%s2127_s1 + $0xc0] sm:$0xff]   ;;  %1428 = vmatpush3.bf16.msra.mxu0 %v1604_v1  ;;  %v1609_v6 = vld [vmem:[%s2127_s1 + $0xc8] sm:$0xff]   ;;  %v1613_v10 = vld [vmem:[%s2127_s1 + $0xd0] sm:$0xff]   ;;  %v33_v38 = vunpack.c.0.s8 %v32_v37 }
   0x4   :  { %v1606_v3 = vld [vmem:[%s2127_s1 + $0x80] sm:$0xff]   ;;  %1449 = vmatprep.subr.bf16.mxu1 %v1605_v2  ;;  %1429 = vmatprep.subr.bf16.mxu0 %v1607_v4  ;;  %v1610_v7 = vld [vmem:[%s2127_s1 + $0x88] sm:$0xff]   ;;  %v1614_v11 = vld [vmem:[%s2127_s1 + $0x90] sm:$0xff]  }
   0x5   :  { %1450 = vmatpush3.bf16.msra.mxu1 %v1606_v3  ;;  %v1615_v12 = vld [vmem:[%s2127_s1 + $0x58] sm:$0xff]   ;;  %v1619_v16 = vld [vmem:[%s2127_s1 + $0x60] sm:$0xff]   ;;  %v1623_v20 = vld [vmem:[%s2127_s1 + $0x68] sm:$0xff]   ;;  %v1875_v41 = vsub.s32 %v33_v38, %v35_v33 }
   0x6   :  { %1451 = vmatprep.subr.bf16.mxu1 %v1609_v6  ;;  %v1616_v13 = vld [vmem:[%s2127_s1 + $0x18] sm:$0xff]   ;;  %v1620_v17 = vld [vmem:[%s2127_s1 + $0x20] sm:$0xff]   ;;  %v1624_v21 = vld [vmem:[%s2127_s1 + $0x28] sm:$0xff]  }
   0x7   :  { %1430 = vmatpush3.bf16.msra.mxu0 %v1608_v5  ;;  %v1617_v14 = vld [vmem:[%s2127_s1 + $0xd8] sm:$0xff]   ;;  %v1621_v18 = vld [vmem:[%s2127_s1 + $0xe0] sm:$0xff]   ;;  %v1625_v22 = vld [vmem:[%s2127_s1 + $0xe8] sm:$0xff]  }
   0x8   :  { %1431 = vmatprep.subr.bf16.mxu0 %v1611_v8  ;;  %v1618_v15 = vld [vmem:[%s2127_s1 + $0x98] sm:$0xff]   ;;  %v1622_v19 = vld [vmem:[%s2127_s1 + $0xa0] sm:$0xff]   ;;  %v1626_v23 = vld [vmem:[%s2127_s1 + $0xa8] sm:$0xff]  }
   0x9   :  { %1452 = vmatpush3.bf16.msra.mxu1 %v1610_v7  ;;  %v1627_v24 = vld [vmem:[%s2127_s1 + $0x70] sm:$0xff]   ;;  %v1631_v29 = vld [vmem:[%s2127_s1 + $0x78] sm:$0xff]   ;;  %v22_v34 = vld [vmem:[%s2126_s0] sm:$0xff] }
   0xa   :  { %1453 = vmatprep.subr.bf16.mxu1 %v1613_v10  ;;  %v1628_v25 = vld [vmem:[%s2127_s1 + $0x30] sm:$0xff]   ;;  %v1632_v30 = vld [vmem:[%s2127_s1 + $0x38] sm:$0xff]   ;;  %v1635_v35 = vld [vmem:[%s2127_s1 + $0x140] sm:$0xff]   ;;  %v30_v39 = vcombine.high %v22_v34, %v22_v34  ;;  %v37_v42 = vrot.slane %v22_v34, %v1875_v41 }
   0xb   :  { %1432 = vmatpush3.bf16.msra.mxu0 %v1612_v9  ;;  %v1629_v26 = vld [vmem:[%s2127_s1 + $0xf0] sm:$0xff]   ;;  %v1633_v31 = vld [vmem:[%s2127_s1 + $0xf8] sm:$0xff]   ;;  %v1638_v40 = vld [vmem:[%s2127_s1 + $0x1c0] sm:$0xff]  }
   0xc   :  { %1433 = vmatprep.subr.bf16.mxu0 %v1615_v12  ;;  %v1630_v27 = vld [vmem:[%s2127_s1 + $0xb0] sm:$0xff]   ;;  %v1634_v32 = vld [vmem:[%s2127_s1 + $0xb8] sm:$0xff]   ;;  %v44_v43 = vrot.slane %v30_v39, %v1875_v41  ;;  %v45_v44 = vcombine.high %v37_v42, %v37_v42  ;;  %v1637_v46 = vld [vmem:[%s2127_s1 + $0x100] sm:$0xff]   ;;  %v101_v47 = vpack.c.bf16 %v37_v42, %v37_v42 }
   0xd   :  { %1454 = vmatpush3.bf16.msra.mxu1 %v1614_v11  ;;  %v1639_v49 = vld [vmem:[%s2127_s1 + $0x180] sm:$0xff]   ;;  %v1640_v52 = vld [vmem:[%s2127_s1 + $0x148] sm:$0xff]   ;;  %v1644_v56 = vld [vmem:[%s2127_s1 + $0x150] sm:$0xff]  }
   0xe   :  { %1455 = vmatprep.subr.bf16.mxu1 %v1617_v14  ;;  %v46_v45 = vcombine.high %v44_v43, %v44_v43  ;;  %v103_v48 = vpack.c.bf16 %v44_v43, %v44_v43  ;;  %v102_v50 = vpack.c.bf16 %v45_v44, %v45_v44  ;;  %v1642_v53 = vld [vmem:[%s2127_s1 + $0x1c8] sm:$0xff]   ;;  %v1646_v57 = vld [vmem:[%s2127_s1 + $0x1d0] sm:$0xff]   ;;  %v1648_v60 = vld [vmem:[%s2127_s1 + $0x158] sm:$0xff]  }
   0xf   :  { %1434 = vmatpush3.bf16.msra.mxu0 %v1616_v13  ;;  %v1641_v54 = vld [vmem:[%s2127_s1 + $0x108] sm:$0xff]   ;;  %v1645_v58 = vld [vmem:[%s2127_s1 + $0x110] sm:$0xff]   ;;  %v1650_v61 = vld [vmem:[%s2127_s1 + $0x1d8] sm:$0xff]  }
  0x10   :  { %1435 = vmatprep.subr.bf16.mxu0 %v1619_v16  ;;  %v104_v51 = vpack.c.bf16 %v46_v45, %v46_v45  ;;  %941 = vmatprep.mubr.bf16.mxu0 %v102_v50  ;;  %v1643_v55 = vld [vmem:[%s2127_s1 + $0x188] sm:$0xff]   ;;  %v1647_v59 = vld [vmem:[%s2127_s1 + $0x190] sm:$0xff]   ;;  %v1649_v62 = vld [vmem:[%s2127_s1 + $0x118] sm:$0xff]  }
  0x11   :  { %1456 = vmatpush3.bf16.msra.mxu1 %v1618_v15  ;;  %v1651_v63 = vld [vmem:[%s2127_s1 + $0x198] sm:$0xff]   ;;  %v1652_v0 = vld [vmem:[%s2127_s1 + $0x160] sm:$0xff]   ;;  %v1656_v4 = vld [vmem:[%s2127_s1 + $0x168] sm:$0xff]  }
  0x12   :  { %1457 = vmatprep.subr.bf16.mxu1 %v1621_v18  ;;  %981 = vmatprep.mubr.bf16.mxu1 %v104_v51  ;;  %v1654_v1 = vld [vmem:[%s2127_s1 + $0x1e0] sm:$0xff]   ;;  %v1658_v5 = vld [vmem:[%s2127_s1 + $0x1e8] sm:$0xff]   ;;  %v1660_v8 = vld [vmem:[%s2127_s1 + $0x170] sm:$0xff]  }
  0x13   :  { %1436 = vmatpush3.bf16.msra.mxu0 %v1620_v17  ;;  %v1653_v2 = vld [vmem:[%s2127_s1 + $0x120] sm:$0xff]   ;;  %v1657_v6 = vld [vmem:[%s2127_s1 + $0x128] sm:$0xff]   ;;  %v1662_v9 = vld [vmem:[%s2127_s1 + $0x1f0] sm:$0xff]  }
  0x14   :  { %1437 = vmatprep.subr.bf16.mxu0 %v1623_v20  ;;  %v1655_v3 = vld [vmem:[%s2127_s1 + $0x1a0] sm:$0xff]   ;;  %v1659_v7 = vld [vmem:[%s2127_s1 + $0x1a8] sm:$0xff]   ;;  %v1661_v11 = vld [vmem:[%s2127_s1 + $0x130] sm:$0xff]  }
  0x15   :  { %1458 = vmatpush3.bf16.msra.mxu1 %v1622_v19  ;;  %v23_v10 = vld [vmem:[%s2126_s0 + $0x8] sm:$0xff]  ;;  %v1663_v14 = vld [vmem:[%s2127_s1 + $0x1b0] sm:$0xff]   ;;  %v1664_v15 = vld [vmem:[%s2127_s1 + $0x178] sm:$0xff]  }
  0x16   :  { %1459 = vmatprep.subr.bf16.mxu1 %v1625_v22  ;;  %v54_v12 = vrot.slane %v23_v10, %v1875_v41  ;;  %v47_v13 = vcombine.high %v23_v10, %v23_v10  ;;  %v1666_v18 = vld [vmem:[%s2127_s1 + $0x1f8] sm:$0xff]   ;;  %v1676_v33 = vld [vmem:[%s2127_s1 + $0x288] sm:$0xff]   ;;  %v1677_v34 = vld [vmem:[%s2127_s1 + $0x250] sm:$0xff]  }
  0x17   :  { %1438 = vmatpush3.bf16.msra.mxu0 %v1624_v21  ;;  %v1665_v19 = vld [vmem:[%s2127_s1 + $0x138] sm:$0xff]   ;;  %v1678_v36 = vld [vmem:[%s2127_s1 + $0x210] sm:$0xff]   ;;  %v1685_v43 = vld [vmem:[%s2127_s1 + $0x260] sm:$0xff]  }
  0x18   :  { %1439 = vmatprep.subr.bf16.mxu0 %v1627_v24  ;;  %v62_v16 = vcombine.high %v54_v12, %v54_v12  ;;  %v61_v17 = vrot.slane %v47_v13, %v1875_v41  ;;  %v1667_v22 = vld [vmem:[%s2127_s1 + $0x1b8] sm:$0xff]   ;;  %v1680_v37 = vld [vmem:[%s2127_s1 + $0x290] sm:$0xff]   ;;  %v1687_v44 = vld [vmem:[%s2127_s1 + $0x2e0] sm:$0xff]  }
  0x19   :  { %1460 = vmatpush3.bf16.msra.mxu1 %v1626_v23  ;;  %v1668_v23 = vld [vmem:[%s2127_s1 + $0x240] sm:$0xff]   ;;  %v1681_v38 = vld [vmem:[%s2127_s1 + $0x258] sm:$0xff]   ;;  %v1692_v50 = vld [vmem:[%s2127_s1 + $0x2a8] sm:$0xff]  }
  0x1a   :  { %1461 = vmatprep.subr.bf16.mxu1 %v1629_v26  ;;  %v106_v20 = vpack.c.bf16 %v62_v16, %v62_v16  ;;  %v63_v21 = vcombine.high %v61_v17, %v61_v17  ;;  %v1670_v26 = vld [vmem:[%s2127_s1 + $0x200] sm:$0xff]   ;;  %v107_v28 = vpack.c.bf16 %v61_v17, %v61_v17  ;;  %v1683_v39 = vld [vmem:[%s2127_s1 + $0x2d8] sm:$0xff]   ;;  %v1693_v51 = vld [vmem:[%s2127_s1 + $0x270] sm:$0xff]  }
  0x1b   :  { %1440 = vmatpush3.bf16.msra.mxu0 %v1628_v25  ;;  %v1671_v25 = vld [vmem:[%s2127_s1 + $0x2c0] sm:$0xff]   ;;  %v1684_v42 = vld [vmem:[%s2127_s1 + $0x298] sm:$0xff]  }
  0x1c   :  { %1441 = vmatprep.subr.bf16.mxu0 %v1631_v29  ;;  %v108_v24 = vpack.c.bf16 %v63_v21, %v63_v21  ;;  %v1672_v29 = vld [vmem:[%s2127_s1 + $0x280] sm:$0xff]  }
  0x1d   :  { %1462 = vmatpush3.bf16.msra.mxu1 %v1630_v27  ;;  %v105_v27 = vpack.c.bf16 %v54_v12, %v54_v12  ;;  %v1686_v45 = vld [vmem:[%s2127_s1 + $0x220] sm:$0xff]  }
  0x1e   :  { %1463 = vmatprep.subr.bf16.mxu1 %v1633_v31  ;;  %v1675_v31 = vld [vmem:[%s2127_s1 + $0x2c8] sm:$0xff]  }
  0x1f   :  { %1442 = vmatpush3.bf16.msra.mxu0 %v1632_v30  ;;  %v1673_v30 = vld [vmem:[%s2127_s1 + $0x248] sm:$0xff]  }
  0x20   :  { %1471 = vmatprep.subr.bf16.mxu0 %v1635_v35  ;;  %v1679_v35 = vld [vmem:[%s2127_s1 + $0x2d0] sm:$0xff]  }
  0x21   :  { %1464 = vmatpush3.bf16.msra.mxu1 %v1634_v32  ;;  %v1674_v32 = vld [vmem:[%s2127_s1 + $0x208] sm:$0xff]  }
  0x22   :  { %1493 = vmatprep.subr.bf16.mxu1 %v1638_v40  ;;  %942 = vmatmul.mubr.bf16.vlgmr.msra.gmra.mrb[0].mxu0 %v101_v47  ;;  %v1682_v40 = vld [vmem:[%s2127_s1 + $0x218] sm:$0xff]   ;;  %v1689_v47 = vld [vmem:[%s2127_s1 + $0x268] sm:$0xff]  }
  0x23   :  { %1472 = vmatpush3.bf16.msra.mxu0 %v1637_v46  ;;  %1021 = vmatprep.mubr.bf16.mxu0 %v106_v20  ;;  %v1688_v46 = vld [vmem:[%s2127_s1 + $0x2a0] sm:$0xff]  }
  0x24   :  { %982 = vmatmul.mubr.bf16.vlgmr.msra.gmra.mrb[0].mxu1 %v103_v48  ;;  %1473 = vmatprep.subr.bf16.mxu0 %v1640_v52  ;;  %v1691_v48 = vld [vmem:[%s2127_s1 + $0x2e8] sm:$0xff]   ;;  %v1695_v52 = vld [vmem:[%s2127_s1 + $0x2f0] sm:$0xff]  }
  0x25   :  { %1494 = vmatpush3.bf16.msra.mxu1 %v1639_v49  ;;  %1061 = vmatprep.mubr.bf16.mxu1 %v108_v24  ;;  %v1690_v49 = vld [vmem:[%s2127_s1 + $0x228] sm:$0xff]  }
  0x26   :  { %1495 = vmatprep.subr.bf16.mxu1 %v1642_v53  ;;  %v24_v53 = vld [vmem:[%s2126_s0 + $0x10] sm:$0xff] }
  0x27   :  { %1474 = vmatpush3.bf16.msra.mxu0 %v1641_v54  ;;  %v1694_v54 = vld [vmem:[%s2127_s1 + $0x230] sm:$0xff]  }
  0x28   :  { %1475 = vmatprep.subr.bf16.mxu0 %v1644_v56  ;;  %v64_v56 = vcombine.high %v24_v53, %v24_v53 }
  0x29   :  { %1496 = vmatpush3.bf16.msra.mxu1 %v1643_v55  ;;  %v71_v55 = vrot.slane %v24_v53, %v1875_v41 }
  0x2a   :  { %1497 = vmatprep.subr.bf16.mxu1 %v1646_v57  ;;  %v1696_v57 = vld [vmem:[%s2127_s1 + $0x2b0] sm:$0xff]  }
  0x2b   :  { %1476 = vmatpush3.bf16.msra.mxu0 %v1645_v58  ;;  %v1697_v58 = vld [vmem:[%s2127_s1 + $0x278] sm:$0xff]  }
  0x2c   :  { %1477 = vmatprep.subr.bf16.mxu0 %v1648_v60  ;;  %v79_v60 = vcombine.high %v71_v55, %v71_v55 }
  0x2d   :  { %1498 = vmatpush3.bf16.msra.mxu1 %v1647_v59  ;;  %v1699_v59 = vld [vmem:[%s2127_s1 + $0x2f8] sm:$0xff]  }
  0x2e   :  { %1499 = vmatprep.subr.bf16.mxu1 %v1650_v61  ;;  %v78_v61 = vrot.slane %v64_v56, %v1875_v41 }
  0x2f   :  { %1478 = vmatpush3.bf16.msra.mxu0 %v1649_v62  ;;  %v1698_v62 = vld [vmem:[%s2127_s1 + $0x238] sm:$0xff]  }
  0x30   :  { %1479 = vmatprep.subr.bf16.mxu0 %v1652_v0  ;;  %v110_v0 = vpack.c.bf16 %v79_v60, %v79_v60 }
  0x31   :  { %1500 = vmatpush3.bf16.msra.mxu1 %v1651_v63  ;;  %v1700_v63 = vld [vmem:[%s2127_s1 + $0x2b8] sm:$0xff]  }
  0x32   :  { %1501 = vmatprep.subr.bf16.mxu1 %v1654_v1  ;;  %v80_v1 = vcombine.high %v78_v61, %v78_v61 }
  0x33   :  { %1480 = vmatpush3.bf16.msra.mxu0 %v1653_v2 }
  0x34   :  { %1481 = vmatprep.subr.bf16.mxu0 %v1656_v4  ;;  %v112_v2 = vpack.c.bf16 %v80_v1, %v80_v1 }
  0x35   :  { %1502 = vmatpush3.bf16.msra.mxu1 %v1655_v3 }
  0x36   :  { %1503 = vmatprep.subr.bf16.mxu1 %v1658_v5 }
  0x37   :  { %1482 = vmatpush3.bf16.msra.mxu0 %v1657_v6 }
  0x38   :  { %1483 = vmatprep.subr.bf16.mxu0 %v1660_v8 }
  0x39   :  { %1504 = vmatpush3.bf16.msra.mxu1 %v1659_v7 }
  0x3a   :  { %1505 = vmatprep.subr.bf16.mxu1 %v1662_v9 }
  0x3b   :  { %1484 = vmatpush3.bf16.msra.mxu0 %v1661_v11 }
  0x3c   :  { %1485 = vmatprep.subr.bf16.mxu0 %v1664_v15 }
  0x3d   :  { %1506 = vmatpush3.bf16.msra.mxu1 %v1663_v14 }
  0x3e   :  { %1507 = vmatprep.subr.bf16.mxu1 %v1666_v18 }
  0x3f   :  { %1486 = vmatpush3.bf16.msra.mxu0 %v1665_v19 }
  0x40   :  { %1515 = vmatprep.subr.bf16.mxu0 %v1668_v23 }
  0x41   :  { %1508 = vmatpush3.bf16.msra.mxu1 %v1667_v22 }
  0x42   :  { %1537 = vmatprep.subr.bf16.mxu1 %v1671_v25  ;;  %1022 = vmatmul.mubr.bf16.vlgmr.msra.gmra.mrb[4].mxu0 %v105_v27 }
  0x43   :  { %1516 = vmatpush3.bf16.msra.mxu0 %v1670_v26  ;;  %1101 = vmatprep.mubr.bf16.mxu0 %v110_v0 }
  0x44   :  { %1062 = vmatmul.mubr.bf16.vlgmr.msra.gmra.mrb[4].mxu1 %v107_v28  ;;  %1517 = vmatprep.subr.bf16.mxu0 %v1673_v30 }
  0x45   :  { %1538 = vmatpush3.bf16.msra.mxu1 %v1672_v29  ;;  %1141 = vmatprep.mubr.bf16.mxu1 %v112_v2 }
  0x46   :  { %1539 = vmatprep.subr.bf16.mxu1 %v1675_v31 }
  0x47   :  { %1518 = vmatpush3.bf16.msra.mxu0 %v1674_v32 }
  0x48   :  { %1519 = vmatprep.subr.bf16.mxu0 %v1677_v34 }
  0x49   :  { %1540 = vmatpush3.bf16.msra.mxu1 %v1676_v33 }
  0x4a   :  { %1541 = vmatprep.subr.bf16.mxu1 %v1679_v35 }
  0x4b   :  { %1520 = vmatpush3.bf16.msra.mxu0 %v1678_v36 }
  0x4c   :  { %1521 = vmatprep.subr.bf16.mxu0 %v1681_v38 }
  0x4d   :  { %1542 = vmatpush3.bf16.msra.mxu1 %v1680_v37 }
  0x4e   :  { %1543 = vmatprep.subr.bf16.mxu1 %v1683_v39 }
  0x4f   :  { %1522 = vmatpush3.bf16.msra.mxu0 %v1682_v40 }
  0x50   :  { %1523 = vmatprep.subr.bf16.mxu0 %v1685_v43 }
  0x51   :  { %1544 = vmatpush3.bf16.msra.mxu1 %v1684_v42 }
  0x52   :  { %1545 = vmatprep.subr.bf16.mxu1 %v1687_v44 }
  0x53   :  { %1524 = vmatpush3.bf16.msra.mxu0 %v1686_v45 }
  0x54   :  { %1525 = vmatprep.subr.bf16.mxu0 %v1689_v47 }
  0x55   :  { %1546 = vmatpush3.bf16.msra.mxu1 %v1688_v46 }
  0x56   :  { %1547 = vmatprep.subr.bf16.mxu1 %v1691_v48 }
  0x57   :  { %1526 = vmatpush3.bf16.msra.mxu0 %v1690_v49 }
  0x58   :  { %1527 = vmatprep.subr.bf16.mxu0 %v1693_v51 }
  0x59   :  { %1548 = vmatpush3.bf16.msra.mxu1 %v1692_v50 }
  0x5a   :  { %1549 = vmatprep.subr.bf16.mxu1 %v1695_v52 }
  0x5b   :  { %1528 = vmatpush3.bf16.msra.mxu0 %v1694_v54 }
  0x5c   :  { %1529 = vmatprep.subr.bf16.mxu0 %v1697_v58 }
  0x5d   :  { %1550 = vmatpush3.bf16.msra.mxu1 %v1696_v57 }
  0x5e   :  { %1551 = vmatprep.subr.bf16.mxu1 %v1699_v59 }
  0x5f   :  { %10 = vsyncpa [#allocation3], 0  ;;  %v109_v41 = vpack.c.bf16 %v71_v55, %v71_v55  ;;  %v111_v3 = vpack.c.bf16 %v78_v61, %v78_v61  ;;  %1530 = vmatpush3.bf16.msra.mxu0 %v1698_v62  ;;  %v1702_v4 = vld [vmem:[%s2127_s1 + $0x300] sm:$0xff]   ;;  %v1737_v5 = vmov 0.0   ;;  %v1703_v6 = vld [vmem:[%s2127_s1 + $0x308] sm:$0xff]   ;;  %vm1738_vm0 = vmmov 0  }
  0x60   :  { %1571 = vmatprep.subr.bf16.mxu0 %v1737_v5  ;;  %v1317_v7 = vld.sshfl [vmem:[%s2126_s0 + $0x18] sm:$0x3 pattern:$0x76325410]  ;;  %vm905_vm1 = vcmask 261120   ;;  %v1704_v9 = vld [vmem:[%s2129_s3] sm:$0xff]  }
  0x61   :  { %1552 = vmatpush3.bf16.msra.mxu1 %v1700_v63  ;;  %v113_v8 = vpack.c.bf16 %v1317_v7, %v1317_v7  ;;  %v1705_v10 = vld [vmem:[%s2129_s3 + $0x8] sm:$0xff]   ;;  %v1706_v11 = vld [vmem:[%s2129_s3 + $0x10] sm:$0xff]   ;;  %v1707_v12 = vld [vmem:[%s2129_s3 + $0x18] sm:$0xff]   ;;  %s1739_s13 = smov [#allocation2]  }
  0x62   :  { %1579 = vmatprep.subr.bf16.mxu1 %v1737_v5  ;;  %1102 = vmatmul.mubr.bf16.vlgmr.msra.gmra.mrb[8].mxu0 %v109_v41  ;;  %v1708_v13 = vld [vmem:[%s2129_s3 + $0x20] sm:$0xff]   ;;  %v1709_v14 = vld [vmem:[%s2129_s3 + $0x28] sm:$0xff]   ;;  %v1710_v15 = vld [vmem:[%s2129_s3 + $0x30] sm:$0xff]   ;;  %s1309_s14 = sshll.u32 %s1739_s13, 4  ;;  %s1310_s14 = int_to_ptr.vmem [resolvable:$true] %s1309_s14 }
  0x63   :  { %1572 = vmatpush3.bf16.msra.mxu0 %v1702_v4  ;;  %1575 = vmatprep.mubr.msk.bf16.mxu0 %vm1738_vm0, %v1737_v5  ;;  %v1711_v16 = vld [vmem:[%s2129_s3 + $0x38] sm:$0xff]   ;;  %v1318_v19 = vld [vmem:[%s2128_s2] ss:$0 sm:$0xff]  ;;  %s1712_s15 = scalar_lea.vmem %s1310_s14, 32  ;;  %p1717_p1 = scmp.lt.s32.totalorder %s1310_s14, %s1310_s14 }
  0x64   :  { %1142 = vmatmul.mubr.bf16.vlgmr.msra.gmra.mrb[8].mxu1 %v111_v3  ;;  %1573 = vmatprep.subr.bf16.mxu0 %v1737_v5  ;;  %v1418_v62 = vld [vmem:[%s2130_s4] ss:$0 sm:$0xff]  ;;  %p1713_p0 = scmp.ne.s32.totalorder %s1310_s14, %s1712_s15  ;;  %p1718_p2 = scmp.lt.s32.totalorder %s1712_s15, %s1712_s15 }
  0x65   :  { %1595 = vmatprep.mubr.msk.bf16.mxu1 %vm1738_vm0, %v1737_v5  ;;  %1580 = vmatpush3.bf16.msra.mxu1 %v1704_v9 }
  0x66   :  { %1581 = vmatprep.subr.bf16.mxu1 %v1737_v5  ;;  %p1719_p3 = por %p1718_p2, %p1717_p1 }
  0x67   :  { %1574 = vmatpush3.bf16.msra.mxu0 %v1703_v6 }
  0x68   :  { %p1720_p4 = pnand %p1719_p3, %p1713_p0 }
  0x69   :  { %1582 = vmatpush3.bf16.msra.mxu1 %v1705_v10 }
  0x6a   :  { %1576 = vmatmul.mubr.msk.bf16.vlgmr.msra.gmra.mrb[12].mxu0 %vm905_vm1, %v113_v8  ;;  %1583 = vmatprep.subr.bf16.mxu1 %v1737_v5 }
  0x6d   :  { %1584 = vmatpush3.bf16.msra.mxu1 %v1706_v11 }
  0x6e   :  { %1585 = vmatprep.subr.bf16.mxu1 %v1737_v5 }
  0x71   :  { %1586 = vmatpush3.bf16.msra.mxu1 %v1707_v12 }
  0x72   :  { %1587 = vmatprep.subr.bf16.mxu1 %v1737_v5 }
  0x75   :  { %1588 = vmatpush3.bf16.msra.mxu1 %v1708_v13 }
  0x76   :  { %1589 = vmatprep.subr.bf16.mxu1 %v1737_v5 }
  0x79   :  { %1590 = vmatpush3.bf16.msra.mxu1 %v1709_v14 }
  0x7a   :  { %1591 = vmatprep.subr.bf16.mxu1 %v1737_v5 }
  0x7d   :  { %1592 = vmatpush3.bf16.msra.mxu1 %v1710_v15 }
  0x7e   :  { %1593 = vmatprep.subr.bf16.mxu1 %v1737_v5 }
  0x81   :  { %1594 = vmatpush3.bf16.msra.mxu1 %v1711_v16 }
  0xf5   :  { %v1443_v17 = vpop.f32.mrb[0].mxu0 }
  0xf6   :  { %v1444_v20 = vpop.f32.mrb[1].mxu0 }
  0xf7   :  { %v1465_v18 = vpop.f32.mrb[0].mxu1  ;;  %v1445_v22 = vadd.f32 %v1444_v20, %v1443_v17  ;;  %v1446_v23 = vpop.f32.mrb[2].mxu0 }
  0xf8   :  { %v1466_v21 = vpop.f32.mrb[1].mxu1  ;;  %v1447_v26 = vpop.f32.mrb[3].mxu0 }
  0xf9   :  { %v1467_v24 = vadd.f32 %v1466_v21, %v1465_v18  ;;  %v1468_v25 = vpop.f32.mrb[2].mxu1  ;;  %v944_v28 = vadd.f32 %v1445_v22, %v1318_v19 }
  0xfa   :  { %v1469_v27 = vpop.f32.mrb[3].mxu1 }
  0xfb   :  { %v984_v29 = vadd.f32 %v1467_v24, %v944_v28 }
 0x115   :  { %v1487_v30 = vpop.f32.mrb[4].mxu0 }
 0x116   :  { %v1488_v32 = vpop.f32.mrb[5].mxu0 }
 0x117   :  { %v1509_v31 = vpop.f32.mrb[4].mxu1  ;;  %v1489_v34 = vadd.f32 %v1488_v32, %v1487_v30  ;;  %v1490_v35 = vpop.f32.mrb[6].mxu0 }
 0x118   :  { %v1510_v33 = vpop.f32.mrb[5].mxu1  ;;  %v1491_v38 = vpop.f32.mrb[7].mxu0 }
 0x119   :  { %v1511_v36 = vadd.f32 %v1510_v33, %v1509_v31  ;;  %v1512_v37 = vpop.f32.mrb[6].mxu1  ;;  %v1024_v40 = vadd.f32 %v1489_v34, %v984_v29 }
 0x11a   :  { %v1513_v39 = vpop.f32.mrb[7].mxu1 }
 0x11b   :  { %v1064_v42 = vadd.f32 %v1511_v36, %v1024_v40 }
 0x135   :  { %v1531_v43 = vpop.f32.mrb[8].mxu0 }
 0x136   :  { %v1532_v45 = vpop.f32.mrb[9].mxu0 }
 0x137   :  { %v1553_v44 = vpop.f32.mrb[8].mxu1  ;;  %v1533_v47 = vadd.f32 %v1532_v45, %v1531_v43  ;;  %v1534_v48 = vpop.f32.mrb[10].mxu0 }
 0x138   :  { %v1554_v46 = vpop.f32.mrb[9].mxu1  ;;  %v1535_v51 = vpop.f32.mrb[11].mxu0 }
 0x139   :  { %v1555_v49 = vadd.f32 %v1554_v46, %v1553_v44  ;;  %v1556_v50 = vpop.f32.mrb[10].mxu1  ;;  %v1104_v53 = vadd.f32 %v1533_v47, %v1064_v42 }
 0x13a   :  { %v1557_v52 = vpop.f32.mrb[11].mxu1 }
 0x13b   :  { %v1144_v54 = vadd.f32 %v1555_v49, %v1104_v53 }
 0x13d   :  { %v1183_v55 = vpop.f32.mrb[12].mxu0 }
 0x13e   :  { %v1184_v56 = vadd.f32 %v1183_v55, %v1144_v54  ;;  %v1577_v57 = vpop.f32.mrb[13].mxu0 }
 0x13f   :  { %v1186_v58 = vpop.f32.mrb[14].mxu0 }
 0x140   :  { %v1189_v59 = vmax.f32 %v1184_v56, 0.0  ;;  %v1578_v60 = vpop.f32.mrb[15].mxu0 }
 0x142   :  { %v1190_v61 = vpack.c.bf16 %v1189_v59, %v1189_v59 }
 0x144   :  { %1596 = vmatmul.mubr.bf16.vlgmr.msra.gmra.mrb[12].mxu1 %v1190_v61 }
 0x217   :  { %v1296_v63 = vpop.f32.mrb[12].mxu1 }
 0x218   :  { %v1297_v0 = vadd.f32 %v1418_v62, %v1296_v63  ;;  %v1597_v1 = vpop.f32.mrb[13].mxu1 }
 0x219   :  { %v1299_v2 = vpop.f32.mrb[14].mxu1 }
 0x21a   :  { %1302 = vst [vmem:[#allocation2] sm:$0x3] %v1297_v0  ;;  %v1598_v41 = vpop.f32.mrb[15].mxu1 }
 0x21b   :  { %1723 = shalt.err (!%p1720_p4)
}
 0x21c   :  { %s1724_s4 = scalar_lea.hbm %s2131_s5, 32 }
 0x21d   :  { %p1725_p5 = scmp.ne.s32.totalorder %s2131_s5, %s1724_s4  ;;  %p1728_p6 = scmp.lt.u32.totalorder %s1724_s4, %s2131_s5 }
 0x21f   :  { %p1730_p7 = pnand %p1728_p6, %p1725_p5 }
 0x221   :  { %1733 = shalt.err (!%p1730_p7)
}
 0x222   :  { %1312 = dma.vmem_to_hbm [thread:$0]  %s1310_s14, 32, %s2131_s5, [#allocation3]  }
 0x223   :  { %1734 = dma.done.wait [#allocation3], 32  }
 0x224   :  { %1735 = vsyncadd [#allocation3], 4294967264 }
 0x225   :  { %1316 = vsyncpa [#allocation3], 1 }

</bundles_post_ra>
